<compile_context>
chip_gen: v7x
topology: tpu7x:2x2x1
jax: 0.10.0
libtpu: 0.0.40
codegen_flags: <defaults>
</compile_context>

<pallas_src>
import functools

import jax
import jax.numpy as jnp
from jax import lax
from jax.experimental import pallas as pl
from jax.experimental.pallas import tpu as pltpu


def _round_up(x, m):
    return (x + m - 1) // m * m


def _largest_divisor_tile(total, max_tile, quantum=128):
    """Largest multiple of `quantum` that divides `total` and is <= max_tile."""
    best = quantum
    t = quantum
    while t <= max_tile and t <= total:
        if total % t == 0:
            best = t
        t += quantum
    return best


def _apply_act(y, act):
    """Activation in f32. Shared by the Pallas kernel and the XLA reference path."""
    if act in ("silu", "silu_"):
        # x * sigmoid(x); stable sigmoid via tanh (EUP transcendental, VPU-free).
        return y * (0.5 * (jnp.tanh(0.5 * y) + 1.0))
    if act == "relu":
        return jnp.maximum(y, 0.0)
    if act == "lrelu":
        return jnp.where(y >= 0, y, 0.1 * y)
    if act == "linear":
        return y
    raise ValueError(f"unsupported activation: {act}")


# -----------------------------------------------------------------------------
# Pallas kernel: tiled GEMM with f32 VMEM accumulator over the contraction axis,
# per-channel (folded-BN) scale + bias + activation epilogue on the last k step.
# -----------------------------------------------------------------------------
def _gemm_scale_bias_act_kernel(x_ref, w_ref, s_ref, b_ref, o_ref, acc_ref, *, act):
    k = pl.program_id(2)

    @pl.when(k == 0)
    def _init():
        acc_ref[...] = jnp.zeros_like(acc_ref)

    acc_ref[...] += jnp.dot(x_ref[...], w_ref[...],
                            preferred_element_type=jnp.float32)

    @pl.when(k == pl.num_programs(2) - 1)
    def _finalize():
        # (tm,tn) * (1,tn) + (1,tn) in f32; activation; store lane-dense bf16.
        y = acc_ref[...] * s_ref[...] + b_ref[...]
        o_ref[...] = _apply_act(y, act).astype(o_ref.dtype)


def _pick_tiles(M, Kc, Coutp):
    """Adaptive (tm, tn, tk) so each grid step amortizes per-step overhead."""
    tn = 256 if Coutp % 256 == 0 else 128
    tk = _largest_divisor_tile(Kc, 2048)
    nk = Kc // tk
    # Size the row tile from a VMEM budget (operand tiles are double-buffered).
    budget = 24 * 1024 * 1024
    fixed = 2 * tk * tn * 2                                  # streamed bf16 weights
    per_row = 2 * tk * 2 + tn * 4 + 2 * tn * 2               # lhs(x2) + acc + out(x2)
    tm = max(16, min(2048, (budget - fixed) // per_row))
    tm = min(tm, _round_up(M, 16))
    tm = max(16, (tm // 16) * 16)                            # bf16 packs 16 rows/tile
    # Megacore / step-overhead: prefer >=2 programs on a parallel axis.
    if (_round_up(M, tm) // tm) * (Coutp // tn) < 2 and M > 16:
        tm = max(16, _round_up((M + 1) // 2, 16))
    Mp = _round_up(M, tm)
    if Mp // tm == 1 and Coutp // tn == 1 and Coutp >= 256:
        tn = 128
    return tm, tn, tk, nk, Mp


def _conv_bn_act_pallas(spec, x, cin, *, eps=1e-5):
    """BaseConv.forward (eval mode) on an NHWC, channel-padded bf16 activation.

    x: (N, H, W, Cs) bf16 with Cs >= cin (channels beyond `cin` are ignored: the
    corresponding weight rows are zero-padded). Returns (y, cout) where y is
    (N, Ho, Wo, round_up(cout,128)) bf16 and channels >= cout are exactly zero.
    """
    w = spec["w"]                                   # (cout, cin, K, K) f32
    stride, act = spec["stride"], spec["act"]
    cout, cin_w, K, K2 = w.shape
    assert cin_w == cin and K == K2, (w.shape, cin)
    pad = (K - 1) // 2
    N, H, W_, Cs = x.shape
    Cp = _round_up(max(Cs, cin), 128)
    if Cs < Cp:
        x = jnp.pad(x, ((0, 0), (0, 0), (0, 0), (0, Cp - Cs)))
    Ho = (H + 2 * pad - K) // stride + 1
    Wo = (W_ + 2 * pad - K) // stride + 1
    Coutp = _round_up(cout, 128)

    # Eval-mode BN folded to a per-channel (scale, bias) pair, applied in f32 in the
    # kernel epilogue (keeps the bf16 weights un-scaled -> no mantissa loss).
    scale = spec["gamma"] * lax.rsqrt(spec["var"] + eps)
    bias = spec["beta"] - spec["mean"] * scale
    scale_p = jnp.pad(scale, (0, Coutp - cout)).reshape(1, Coutp).astype(jnp.float32)
    bias_p = jnp.pad(bias, (0, Coutp - cout)).reshape(1, Coutp).astype(jnp.float32)

    # GEMM rhs: (K, K, Cp, Coutp) bf16 flattened to (K*K*Cp, Coutp).
    w_hwio = jnp.transpose(w, (2, 3, 1, 0)).astype(jnp.bfloat16)
    w_hwio = jnp.pad(w_hwio, ((0, 0), (0, 0), (0, Cp - cin), (0, Coutp - cout)))
    rhs = w_hwio.reshape(K * K * Cp, Coutp)

    # GEMM lhs.
    if K == 1:
        xs = x if stride == 1 else x[:, ::stride, ::stride, :]
        lhs = xs.reshape(N * Ho * Wo, Cp)
    else:
        # TODO(synk): replace this materialized im2col with an in-kernel halo-DMA
        #             gather (memory_space=pl.ANY + pltpu.make_async_copy).
        x_p = jnp.pad(x, ((0, 0), (pad, pad), (pad, pad), (0, 0)))
        taps = [x_p[:, kh:kh + stride * Ho:stride, kw:kw + stride * Wo:stride, :]
                for kh in range(K) for kw in range(K)]
        lhs = jnp.concatenate(taps, axis=-1).reshape(N * Ho * Wo, K * K * Cp)

    M, Kc = lhs.shape
    tm, tn, tk, nk, Mp = _pick_tiles(M, Kc, Coutp)
    if Mp > M:
        lhs = jnp.pad(lhs, ((0, Mp - M), (0, 0)))

    # Scoped-VMEM limit: actual tile footprint + headroom, never v7x-physical 64 MiB.
    vmem_need = (2 * tm * tk * 2 + 2 * tk * tn * 2 + tm * tn * 4
                 + 2 * tm * tn * 2 + 4 * tn * 4)
    vmem_limit = int(min(48 * 1024 * 1024, vmem_need + 16 * 1024 * 1024))

    out = pl.pallas_call(
        functools.partial(_gemm_scale_bias_act_kernel, act=act),
        out_shape=jax.ShapeDtypeStruct((Mp, Coutp), jnp.bfloat16),
        grid=(Mp // tm, Coutp // tn, nk),
        in_specs=[
            # pixel-row tile: independent of j -> stays resident across the Cout axis
            pl.BlockSpec((tm, tk), lambda i, j, k: (i, k)),
            # weight tile: streamed over (k, j)
            pl.BlockSpec((tk, tn), lambda i, j, k: (k, j)),
            # per-channel BN scale / bias (f32), resident per j
            pl.BlockSpec((1, tn), lambda i, j, k: (0, j)),
            pl.BlockSpec((1, tn), lambda i, j, k: (0, j)),
        ],
        out_specs=pl.BlockSpec((tm, tn), lambda i, j, k: (i, j)),   # lane-dense stores
        scratch_shapes=[pltpu.VMEM((tm, tn), jnp.float32)],
        compiler_params=pltpu.CompilerParams(
            dimension_semantics=("parallel", "parallel", "arbitrary"),
            vmem_limit_bytes=vmem_limit),
    )(lhs, rhs, scale_p, bias_p)

    y = out[:M].reshape(N, Ho, Wo, Coutp)
    return y, cout


def _max_pool_nhwc(x, ksize):
    """nn.MaxPool2d(kernel_size=ksize, stride=1, padding=ksize//2), NHWC."""
    p = ksize // 2
    return lax.reduce_window(
        x, jnp.array(-jnp.inf, x.dtype), lax.max,
        window_dimensions=(1, ksize, ksize, 1), window_strides=(1, 1, 1, 1),
        padding=((0, 0), (p, p), (p, p), (0, 0)))


# -----------------------------------------------------------------------------
# XLA reference path (NCHW, identical quantization choices) for self-checking.
# -----------------------------------------------------------------------------
def _base_conv_ref(spec, x_nchw, *, eps=1e-5):
    w = spec["w"]
    K = w.shape[2]
    stride = spec["stride"]
    pad = (K - 1) // 2
    scale = spec["gamma"] * lax.rsqrt(spec["var"] + eps)
    bias = spec["beta"] - spec["mean"] * scale
    x_nhwc = jnp.transpose(x_nchw, (0, 2, 3, 1)).astype(jnp.bfloat16)
    w_hwio = jnp.transpose(w, (2, 3, 1, 0)).astype(jnp.bfloat16)
    y = lax.conv_general_dilated(
        x_nhwc, w_hwio, window_strides=(stride, stride),
        padding=((pad, pad), (pad, pad)),
        dimension_numbers=("NHWC", "HWIO", "NHWC"),
        preferred_element_type=jnp.float32)
    y = _apply_act(y * scale[None, None, None, :] + bias[None, None, None, :],
                   spec["act"])
    return jnp.transpose(y.astype(jnp.bfloat16), (0, 3, 1, 2))


def _max_pool_ref(x_nchw, ksize):
    p = ksize // 2
    return lax.reduce_window(
        x_nchw, jnp.array(-jnp.inf, x_nchw.dtype), lax.max,
        window_dimensions=(1, 1, ksize, ksize), window_strides=(1, 1, 1, 1),
        padding=((0, 0), (0, 0), (p, p), (p, p)))


# -----------------------------------------------------------------------------
# Darknet (depth 21/53) parameter init + forward.
# -----------------------------------------------------------------------------
def _init_base_conv(key, cin, cout, ksize, stride, act):
    kw, kg, kb, km, kv = jax.random.split(key, 5)
    fan_in = float(cin * ksize * ksize)
    return {
        "type": "conv", "stride": stride, "act": act,
        "w": jax.random.normal(kw, (cout, cin, ksize, ksize), jnp.float32)
             * (fan_in ** -0.5),
        "gamma": 1.0 + 0.1 * jax.random.normal(kg, (cout,), jnp.float32),
        "beta": 0.1 * jax.random.normal(kb, (cout,), jnp.float32),
        "mean": 0.1 * jax.random.normal(km, (cout,), jnp.float32),
        "var": 0.5 + jnp.abs(jax.random.normal(kv, (cout,), jnp.float32)),
    }


class _KeyGen:
    def __init__(self, key):
        self._key = key
        self._n = 0

    def __call__(self):
        self._n += 1
        return jax.random.fold_in(self._key, self._n)


def _make_group_layer(kg, in_ch, num_blocks, stride):
    layers = [_init_base_conv(kg(), in_ch, in_ch * 2, 3, stride, "lrelu")]
    for _ in range(num_blocks):
        layers.append({"type": "res", "layers": [
            _init_base_conv(kg(), in_ch * 2, in_ch, 1, 1, "lrelu"),
            _init_base_conv(kg(), in_ch, in_ch * 2, 3, 1, "lrelu"),
        ]})
    return layers


def _make_spp_block(kg, filters_list, in_filters):
    c1, c2 = filters_list
    hidden = c2 // 2
    return [
        _init_base_conv(kg(), in_filters, c1, 1, 1, "lrelu"),
        _init_base_conv(kg(), c1, c2, 3, 1, "lrelu"),
        {"type": "spp", "ks": (5, 9, 13),
         "conv1": _init_base_conv(kg(), c2, hidden, 1, 1, "lrelu"),
         "conv2": _init_base_conv(kg(), hidden * 4, c1, 1, 1, "lrelu")},
        _init_base_conv(kg(), c1, c2, 3, 1, "lrelu"),
        _init_base_conv(kg(), c2, c1, 1, 1, "lrelu"),
    ]


def init_darknet(key, depth=21, in_channels=3, stem_out_channels=8,
                 out_features=("dark3", "dark4", "dark5")):
    blocks = {21: [1, 2, 2, 1], 53: [2, 8, 8, 4]}[depth]
    kg = _KeyGen(key)
    net = {"out_features": tuple(out_features)}
    net["stem"] = ([_init_base_conv(kg(), in_channels, stem_out_channels, 3, 1, "lrelu")]
                   + _make_group_layer(kg, stem_out_channels, 1, 2))
    ch = stem_out_channels * 2
    net["dark2"] = _make_group_layer(kg, ch, blocks[0], 2)
    ch *= 2
    net["dark3"] = _make_group_layer(kg, ch, blocks[1], 2)
    ch *= 2
    net["dark4"] = _make_group_layer(kg, ch, blocks[2], 2)
    ch *= 2
    net["dark5"] = (_make_group_layer(kg, ch, blocks[3], 2)
                    + _make_spp_block(kg, [ch, ch * 2], ch * 2))
    return net


# ---- Pallas (persistent NHWC, channel-padded bf16) forward --------------------------
def _apply_layer_nhwc(spec, x, c):
    kind = spec["type"]
    if kind == "conv":
        return _conv_bn_act_pallas(spec, x, c)
    if kind == "res":                      # ResLayer: x + conv3x3(conv1x1(x))
        out, oc = x, c
        for sub in spec["layers"]:
            out, oc = _apply_layer_nhwc(sub, out, oc)
        assert oc == c and out.shape == x.shape, (oc, c, out.shape, x.shape)
        return x + out, c
    if kind == "spp":                      # SPPBottleneck
        y, hc = _conv_bn_act_pallas(spec["conv1"], x, c)
        ys = y[..., :hc]
        feats = [ys] + [_max_pool_nhwc(ys, k) for k in spec["ks"]]
        z = jnp.concatenate(feats, axis=-1)
        return _conv_bn_act_pallas(spec["conv2"], z, z.shape[-1])
    raise ValueError(kind)


def _apply_seq_nhwc(specs, x, c):
    for spec in specs:
        x, c = _apply_layer_nhwc(spec, x, c)
    return x, c


# ---- XLA reference forward -----------------------------------------------------------
def _apply_layer_ref(spec, x):
    kind = spec["type"]
    if kind == "conv":
        return _base_conv_ref(spec, x)
    if kind == "res":
        out = x
        for sub in spec["layers"]:
            out = _apply_layer_ref(sub, out)
        return x + out
    if kind == "spp":
        y = _base_conv_ref(spec["conv1"], x)
        feats = [y] + [_max_pool_ref(y, k) for k in spec["ks"]]
        return _base_conv_ref(spec["conv2"], jnp.concatenate(feats, axis=1))
    raise ValueError(kind)


def _apply_seq_ref(specs, x):
    for spec in specs:
        x = _apply_layer_ref(spec, x)
    return x


def darknet_forward(net, x_nchw, use_pallas=True):
    stages = ("stem", "dark2", "dark3", "dark4", "dark5")
    out_features = net["out_features"]
    outputs = {}
    if not use_pallas:
        x = x_nchw
        for name in stages:
            x = _apply_seq_ref(net[name], x)
            if name in out_features:
                outputs[name] = x.astype(jnp.float32)
        return outputs
    # NCHW -> NHWC bf16 once at the model boundary; channels stay padded between
    # layers (padded channels never leak: their weight rows are zero and they are
    # sliced off before concat / at the outputs).
    x = jnp.transpose(x_nchw, (0, 2, 3, 1)).astype(jnp.bfloat16)
    c = x.shape[-1]
    for name in stages:
        x, c = _apply_seq_nhwc(net[name], x, c)
        if name in out_features:
            outputs[name] = jnp.transpose(x[..., :c], (0, 3, 1, 2)).astype(jnp.float32)
    return outputs


def base_conv_nchw(spec, x_nchw, use_pallas=True):
    """Single BaseConv (NCHW f32 in / NCHW f32 out) for the self-checks."""
    if not use_pallas:
        return _base_conv_ref(spec, x_nchw).astype(jnp.float32)
    x = jnp.transpose(x_nchw, (0, 2, 3, 1)).astype(jnp.bfloat16)
    y, c = _conv_bn_act_pallas(spec, x, x_nchw.shape[1])
    return jnp.transpose(y[..., :c], (0, 3, 1, 2)).astype(jnp.float32)


def _rel_rms(a, b):
    a = a.astype(jnp.float32)
    b = b.astype(jnp.float32)
    num = jnp.sqrt(jnp.mean((a - b) ** 2))
    den = jnp.sqrt(jnp.mean(b ** 2)) + 1e-12
    return float(num / den)


if __name__ == "__main__":
    root = jax.random.PRNGKey(0)

    # ---- 1) Single BaseConv(4 -> 8, k=3, s=1, act=silu) ---------------------------
    k_p, k_x = jax.random.split(jax.random.fold_in(root, 1))
    conv_p = _init_base_conv(k_p, 4, 8, 3, 1, "silu")
    x_small = jax.random.normal(k_x, (2, 4, 16, 16), jnp.float32)
    out_pal = jax.block_until_ready(base_conv_nchw(conv_p, x_small, use_pallas=True))
    out_ref = base_conv_nchw(conv_p, x_small, use_pallas=False)
    assert out_pal.shape == (2, 8, 16, 16), out_pal.shape
    assert jnp.allclose(out_pal, out_ref, atol=2e-2, rtol=2e-2), \
        float(jnp.max(jnp.abs(out_pal - out_ref)))

    # ---- 2) Single BaseConv(16 -> 32, k=3, s=2, act=lrelu) ------------------------
    k_p2, k_x2 = jax.random.split(jax.random.fold_in(root, 2))
    conv_p2 = _init_base_conv(k_p2, 16, 32, 3, 2, "lrelu")
    x_small2 = jax.random.normal(k_x2, (2, 16, 16, 16), jnp.float32)
    out_pal2 = jax.block_until_ready(base_conv_nchw(conv_p2, x_small2, use_pallas=True))
    out_ref2 = base_conv_nchw(conv_p2, x_small2, use_pallas=False)
    assert out_pal2.shape == (2, 32, 8, 8), out_pal2.shape
    assert jnp.allclose(out_pal2, out_ref2, atol=2e-2, rtol=2e-2), \
        float(jnp.max(jnp.abs(out_pal2 - out_ref2)))

    # ---- 3) Full Darknet-21 forward: every BaseConv runs the Pallas kernel --------
    net = init_darknet(jax.random.fold_in(root, 3), depth=21, in_channels=3,
                       stem_out_channels=8)
    x = jax.random.normal(jax.random.fold_in(root, 4), (2, 3, 64, 64), jnp.float32)

    fwd_pallas = jax.jit(functools.partial(darknet_forward, net, use_pallas=True))
    fwd_ref = jax.jit(functools.partial(darknet_forward, net, use_pallas=False))

    outs_pal = jax.block_until_ready(fwd_pallas(x))
    outs_ref = jax.block_until_ready(fwd_ref(x))

    expected = {"dark3": (2, 64, 8, 8), "dark4": (2, 128, 4, 4), "dark5": (2, 128, 2, 2)}
    for name, shape in expected.items():
        a, b = outs_pal[name], outs_ref[name]
        assert a.shape == shape and b.shape == shape, (name, a.shape, b.shape)
        # Both paths use bf16 matmul inputs / bf16 activation storage; tiny per-layer
        # rounding differences drift over 26 layers, so compare with relative RMS.
        err = _rel_rms(a, b)
        assert err < 0.1, (name, err)

    print("KERNEL_OK")
</pallas_src>

<mosaic_0001>
module attributes {stable_mosaic.version = 11 : i64} {
  func.func @_gemm_scale_bias_act_kernel(%arg0: i32, %arg1: i32, %arg2: i32, %arg3: memref<256x1152xbf16, #tpu.memory_space<vmem>>, %arg4: memref<1152x128xbf16, #tpu.memory_space<vmem>>, %arg5: memref<1x128xf32, #tpu.memory_space<vmem>>, %arg6: memref<1x128xf32, #tpu.memory_space<vmem>>, %arg7: memref<256x128xbf16, #tpu.memory_space<vmem>>, %arg8: memref<256x128xf32, #tpu.memory_space<vmem>>) attributes {dimension_semantics = [#tpu.dimension_semantics<parallel>, #tpu.dimension_semantics<parallel>, #tpu.dimension_semantics<arbitrary>], iteration_bounds = array<i64: 2, 1, 1>, scalar_prefetch = 0 : i64, scratch_operands = 1 : i64, tpu.core_type = #tpu.core_type<tc>, window_params = [{transform_indices = @transform_0, window_bounds = array<i64: 256, 1152>}, {transform_indices = @transform_1, window_bounds = array<i64: 1152, 128>}, {transform_indices = @transform_2, window_bounds = array<i64: 1, 128>}, {transform_indices = @transform_3, window_bounds = array<i64: 1, 128>}, {transform_indices = @transform_4, window_bounds = array<i64: 256, 128>}]} {
    %c0_i32 = arith.constant 0 : i32
    %0 = arith.cmpi eq, %arg2, %c0_i32 : i32
    %1 = arith.extui %0 : i1 to i32
    %c0_i32_0 = arith.constant 0 : i32
    %2 = arith.cmpi ne, %1, %c0_i32_0 : i32
    scf.if %2 {
      %cst_10 = arith.constant 0.000000e+00 : f32
      %12 = vector.broadcast %cst_10 : f32 to vector<256x128xf32>
      %c0_11 = arith.constant 0 : index
      %c0_12 = arith.constant 0 : index
      %13 = vector.load %arg8[%c0_11, %c0_12] : memref<256x128xf32, #tpu.memory_space<vmem>>, vector<256x128xf32>
      tpu.vector_store %arg8[%c0_11, %c0_12], %12 {strides = array<i32>} : memref<256x128xf32, #tpu.memory_space<vmem>>, vector<256x128xf32>,
    } else {
    }
    %c0 = arith.constant 0 : index
    %c0_1 = arith.constant 0 : index
    %3 = vector.load %arg8[%c0, %c0_1] : memref<256x128xf32, #tpu.memory_space<vmem>>, vector<256x128xf32>
    %c0_2 = arith.constant 0 : index
    %c0_3 = arith.constant 0 : index
    %4 = vector.load %arg3[%c0_2, %c0_3] : memref<256x1152xbf16, #tpu.memory_space<vmem>>, vector<256x1152xbf16>
    %c0_4 = arith.constant 0 : index
    %c0_5 = arith.constant 0 : index
    %5 = vector.load %arg4[%c0_4, %c0_5] : memref<1152x128xbf16, #tpu.memory_space<vmem>>, vector<1152x128xbf16>
    %cst = arith.constant dense<0.000000e+00> : vector<256x128xf32>
    %6 = tpu.matmul %4, %5, %cst {dimension_numbers = #tpu.dot_dimension_numbers<[1], [0], [0], [1], [0, 0, 1, 1], [], []>} : vector<256x1152xbf16>, vector<1152x128xbf16>, vector<256x128xf32> -> vector<256x128xf32>
    %7 = arith.addf %3, %6 : vector<256x128xf32>
    %c0_6 = arith.constant 0 : index
    %c0_7 = arith.constant 0 : index
    %8 = vector.load %arg8[%c0_6, %c0_7] : memref<256x128xf32, #tpu.memory_space<vmem>>, vector<256x128xf32>
    tpu.vector_store %arg8[%c0_6, %c0_7], %7 {strides = array<i32>} : memref<256x128xf32, #tpu.memory_space<vmem>>, vector<256x128xf32>,
    %c0_i32_8 = arith.constant 0 : i32
    %9 = arith.cmpi eq, %arg2, %c0_i32_8 : i32
    %10 = arith.extui %9 : i1 to i32
    %c0_i32_9 = arith.constant 0 : i32
    %11 = arith.cmpi ne, %10, %c0_i32_9 : i32
    scf.if %11 {
      %c0_10 = arith.constant 0 : index
      %c0_11 = arith.constant 0 : index
      %12 = vector.load %arg8[%c0_10, %c0_11] : memref<256x128xf32, #tpu.memory_space<vmem>>, vector<256x128xf32>
      %c0_12 = arith.constant 0 : index
      %c0_13 = arith.constant 0 : index
      %13 = vector.load %arg5[%c0_12, %c0_13] : memref<1x128xf32, #tpu.memory_space<vmem>>, vector<1x128xf32>
      %14 = vector.broadcast %13 : vector<1x128xf32> to vector<256x128xf32>
      %15 = arith.mulf %12, %14 : vector<256x128xf32>
      %c0_14 = arith.constant 0 : index
      %c0_15 = arith.constant 0 : index
      %16 = vector.load %arg6[%c0_14, %c0_15] : memref<1x128xf32, #tpu.memory_space<vmem>>, vector<1x128xf32>
      %17 = vector.broadcast %16 : vector<1x128xf32> to vector<256x128xf32>
      %18 = arith.addf %15, %17 : vector<256x128xf32>
      %cst_16 = arith.constant 5.000000e-01 : f32
      %19 = vector.broadcast %cst_16 : f32 to vector<256x128xf32>
      %20 = arith.mulf %19, %18 : vector<256x128xf32>
      %21 = math.tanh %20 : vector<256x128xf32>
      %cst_17 = arith.constant 1.000000e+00 : f32
      %22 = vector.broadcast %cst_17 : f32 to vector<256x128xf32>
      %23 = arith.addf %21, %22 : vector<256x128xf32>
      %cst_18 = arith.constant 5.000000e-01 : f32
      %24 = vector.broadcast %cst_18 : f32 to vector<256x128xf32>
      %25 = arith.mulf %24, %23 : vector<256x128xf32>
      %26 = arith.mulf %18, %25 : vector<256x128xf32>
      %27 = arith.truncf %26 : vector<256x128xf32> to vector<256x128xbf16>
      %c0_19 = arith.constant 0 : index
      %c0_20 = arith.constant 0 : index
      %28 = vector.load %arg7[%c0_19, %c0_20] : memref<256x128xbf16, #tpu.memory_space<vmem>>, vector<256x128xbf16>
      tpu.vector_store %arg7[%c0_19, %c0_20], %27 {strides = array<i32>} : memref<256x128xbf16, #tpu.memory_space<vmem>>, vector<256x128xbf16>,
    } else {
    }
    return
  }
  func.func @transform_0(%arg0: i32, %arg1: i32, %arg2: i32) -> (i32, i32) {
    %c0_i32 = arith.constant 0 : i32
    return %arg0, %arg2 : i32, i32
  }
  func.func @transform_1(%arg0: i32, %arg1: i32, %arg2: i32) -> (i32, i32) {
    %c0_i32 = arith.constant 0 : i32
    return %arg2, %arg1 : i32, i32
  }
  func.func @transform_2(%arg0: i32, %arg1: i32, %arg2: i32) -> (i32, i32) {
    %c0_i32 = arith.constant 0 : i32
    %c0_i32_0 = arith.constant 0 : i32
    return %c0_i32, %arg1 : i32, i32
  }
  func.func @transform_3(%arg0: i32, %arg1: i32, %arg2: i32) -> (i32, i32) {
    %c0_i32 = arith.constant 0 : i32
    %c0_i32_0 = arith.constant 0 : i32
    return %c0_i32, %arg1 : i32, i32
  }
  func.func @transform_4(%arg0: i32, %arg1: i32, %arg2: i32) -> (i32, i32) {
    %c0_i32 = arith.constant 0 : i32
    return %arg0, %arg1 : i32, i32
  }
}

</mosaic_0001>

<bundles_post_ra>
// kernel: tpu_custom_call.1
= control target key start
LH: loop header
LB: loop body
LE: loop exit
PB: predicated region body
PF: predicated region fallthrough
CT: control target
= control target key end

     0   :  { %9 = vsyncpa [#allocation4], 0  ;;  %s5897_s0 = inlined_call_operand.hbm [shape: bf16[512,1152], index: 0, kind: input, shape index: {}]   ;;  %s5898_s1 = inlined_call_operand.hbm [shape: bf16[1152,128], index: 1, kind: input, shape index: {}]   ;;  %s5899_s2 = inlined_call_operand.hbm [shape: f32[1,128], index: 2, kind: input, shape index: {}]   ;;  %s5900_s3 = inlined_call_operand.hbm [shape: f32[1,128], index: 3, kind: input, shape index: {}]   ;;  %s5901_s4 = inlined_call_operand.hbm [shape: bf16[512,128], index: 4, kind: output, shape index: {}]  }
   0x1   :  { %11 = vsyncpa [#allocation4 + $0x1], 0 }
   0x2   :  { %12 = vsyncpa [#allocation7], 0 }
   0x3   :  { %13 = vsyncpa [#allocation10], 0 }
   0x4   :  { %14 = vsyncpa [#allocation5], 0 }
   0x5   :  { %16 = vsyncpa [#allocation5 + $0x1], 0  ;;  %s4917_s15 = smov 0   ;;  %s4919_s16 = smov 0  }
   0x6   :  { %s4921_s17 = smov 0   ;;  %s4923_s18 = smov 0  }
   0x7   :  { %s4925_s19 = smov 0   ;;  %s4927_s20 = smov 0  }
   0x8 LB: > { %s3295_s21 = sadd.s32 4294967295, %s4879_s20   ;;  %s3296_s22 = sadd.s32 4294967294, %s4879_s20   ;;  %s4879_s20 = sphi %s4927_s20, %s22_s20   ;;  %s4875_s19 = sphi %s4925_s19, %s5928_s19   ;;  %s4871_s18 = sphi %s4923_s18, %s5927_s18   ;;  %s4867_s17 = sphi %s4921_s17, %s5926_s17   ;;  %s4863_s16 = sphi %s4919_s16, %s5925_s16   ;;  %s4859_s15 = sphi %s4917_s15, %s5924_s15  }
   0x9   : > { %p63_p0 = scmp.ne.s32.totalorder %s4863_s16, %s4859_s15  ;;  %p4951_p1 = scmp.eq.s32.totalorder %s3295_s21, 0 }
   0xa   : > { %p4955_p2 = scmp.eq.s32.totalorder %s3295_s21, 1  ;;  %p175_p3 = scmp.eq.s32.totalorder %s3296_s22, 1 }
   0xb   : > { %s5907_s23 = scalar_select %p4951_p1, 1, 0 }
   0xc   : > { %s5908_s24 = scalar_select %p4955_p2, 1, 0 }
   0xd   : > { %p4961_p4 = por %p4951_p1, %p63_p0  ;;  %p3297_p5 = scmp.ge.s32.totalorder %s4879_s20, 1 }
   0xe   : > { %p4966_p6 = por %p175_p3, %p63_p0  ;;  %p182_p7 = scmp.lt.s32.totalorder %s4879_s20, 3 }
   0xf   : > { %s5909_s25 = scalar_select %p4961_p4, 1, 0 }
  0x10   : > { %s5910_s26 = scalar_select %p4966_p6, 1, 0 }
  0x11   : > { %p4971_p8 = pnand %p3297_p5, %p182_p7  ;;  %s4881_s28 = smov [#allocation6]  }
  0x12   : > { %5911 = sst [smem:[#allocation16_spill]] %s5910_s26  ;;  %s198_s29 = sshll.u32 %s4881_s28, 4  ;;  %s4975_s29 = int_to_ptr.vmem [resolvable:$true] %s198_s29 }
  0x13   : > { %s5912_s27 = scalar_select %p4971_p8, 1, 0 }
  0x14   : > { %p4248_p9 = pneg %p4971_p8  ;;  %s4882_s5 = smov [#allocation8]  }
  0x15   : > { %s214_s6 = sshll.u32 %s4882_s5, 4  ;;  %s4883_s7 = smov [#allocation9]   ;;  %s4986_s6 = int_to_ptr.vmem [resolvable:$true] %s214_s6 }
  0x16   : > { %p4982_p11 = pnand %p4248_p9, %p4951_p1  ;;  %s4988_s8 = sshll.u32 %s4883_s7, 4  ;;  %s228_s8 = int_to_ptr.vmem [resolvable:$true] %s4988_s8 }
  0x17   : > { %s4675_s11 = scalar_lea.hbm %s5898_s1, 9216 }
  0x18   : > { %p4676_p12 = scmp.ne.s32.totalorder %s5898_s1, %s4675_s11  ;;  %p4998_p13 = pneg %p4982_p11 }
  0x19   : > { %p4682_p5 = scmp.lt.u32.totalorder %s4675_s11, %s5898_s1 }
  0x1a   : > { %p4678_p0 = pnand %p4998_p13, %p4676_p12 }
  0x1c   : > { %p4679_p3 = pneg %p4678_p0 }
  0x1e   : > { %p4684_p7 = pnand %p4682_p5, %p4679_p3 }
  0x20   : > { %4687 = shalt.err (!%p4684_p7)
}
  0x21   : > { %s4688_s28 = scalar_lea.vmem %s4975_s29, 9216  ;;  %p4696_p1 = scmp.lt.s32.totalorder %s4975_s29, %s4975_s29 }
  0x22   : > { %p4689_p9 = scmp.ne.s32.totalorder %s4975_s29, %s4688_s28  ;;  %p4697_p4 = scmp.lt.s32.totalorder %s4688_s28, %s4688_s28 }
  0x24   : > { %p4691_p10 = pnand %p4689_p9, %p4998_p13  ;;  %p4698_p12 = por %p4697_p4, %p4696_p1 }
  0x26   : > { %p4692_p6 = pneg %p4691_p10 }
  0x28   : > { %p4699_p0 = pnand %p4698_p12, %p4692_p6 }
  0x2a   : > { %4702 = shalt.err (!%p4699_p0)
}
  0x2b   : > { %s4884_s5 = smov 64   ;;  %s4885_s7 = smov 4  }
  0x2c   : > { %4251 = dma.hbm_to_vmem [thread:$0]  (!%p4982_p11), %s5898_s1, 9216, %s4975_s29, [#allocation7], %s4884_s5, %s4884_s5, %s4885_s7  }
  0x2d   : > { %s4703_s13 = scalar_lea.hbm %s5899_s2, 16 }
  0x2e   : > { %p4704_p1 = scmp.ne.s32.totalorder %s5899_s2, %s4703_s13  ;;  %p4710_p10 = scmp.lt.u32.totalorder %s4703_s13, %s5899_s2 }
  0x30   : > { %p4706_p4 = pnand %p4704_p1, %p4998_p13 }
  0x32   : > { %p4707_p6 = pneg %p4706_p4 }
  0x34   : > { %p4712_p3 = pnand %p4710_p10, %p4707_p6 }
  0x36   : > { %4715 = shalt.err (!%p4712_p3)
}
  0x37   : > { %s4716_s29 = scalar_lea.vmem %s4986_s6, 16  ;;  %s4723_s5 = scalar_lea.vmem %s4986_s6, 32 }
  0x38   : > { %p4717_p5 = scmp.ne.s32.totalorder %s4986_s6, %s4716_s29  ;;  %p4724_p12 = scmp.lt.s32.totalorder %s4986_s6, %s4986_s6 }
  0x39   : > { %p4725_p0 = scmp.lt.s32.totalorder %s4723_s5, %s4716_s29 }
  0x3a   : > { %p4719_p7 = pnand %p4717_p5, %p4998_p13 }
  0x3b   : > { %p4726_p1 = por %p4725_p0, %p4724_p12 }
  0x3c   : > { %p4720_p9 = pneg %p4719_p7 }
  0x3e   : > { %p4727_p4 = pnand %p4726_p1, %p4720_p9 }
  0x40   : > { %4730 = shalt.err (!%p4727_p4)
}
  0x41   : > { %4254 = dma.hbm_to_vmem [thread:$0]  (!%p4982_p11), %s5899_s2, 16, %s4986_s6, [#allocation7]  }
  0x42   : > { %s4731_s11 = scalar_lea.hbm %s5900_s3, 16 }
  0x43   : > { %p4732_p6 = scmp.ne.s32.totalorder %s5900_s3, %s4731_s11  ;;  %p4738_p5 = scmp.lt.u32.totalorder %s4731_s11, %s5900_s3 }
  0x45   : > { %p4734_p10 = pnand %p4732_p6, %p4998_p13 }
  0x47   : > { %p4735_p3 = pneg %p4734_p10 }
  0x49   : > { %p4740_p7 = pnand %p4738_p5, %p4735_p3 }
  0x4b   : > { %4743 = shalt.err (!%p4740_p7)
}
  0x4c   : > { %s4744_s28 = scalar_lea.vmem %s228_s8, 16  ;;  %s4751_s6 = scalar_lea.vmem %s228_s8, 32 }
  0x4d   : > { %p4745_p9 = scmp.ne.s32.totalorder %s228_s8, %s4744_s28  ;;  %p4752_p1 = scmp.lt.s32.totalorder %s228_s8, %s228_s8 }
  0x4e   : > { %p4753_p4 = scmp.lt.s32.totalorder %s4751_s6, %s4744_s28 }
  0x4f   : > { %p4747_p12 = pnand %p4745_p9, %p4998_p13 }
  0x50   : > { %p4754_p8 = por %p4753_p4, %p4752_p1 }
  0x51   : > { %p4748_p0 = pneg %p4747_p12 }
  0x53   : > { %p4755_p2 = pnand %p4754_p8, %p4748_p0 }
  0x55   : > { %4758 = shalt.err (!%p4755_p2)
}
  0x56   : > { %4257 = dma.hbm_to_vmem [thread:$0]  (!%p4982_p11), %s5900_s3, 16, %s228_s8, [#allocation10]  }
  0x57   : > { %s50_s14 = sadd.s32 1, %s4867_s17  ;;  %s41_s26 = sadd.s32 1, %s4875_s19 }
  0x58   : > { %p57_p2 = scmp.ne.s32.totalorder %s4867_s17, %s4863_s16  ;;  %p43_p8 = scmp.ge.s32.totalorder %s41_s26, 2 }
  0x59   : > { %p58_p13 = scmp.eq.s32.totalorder %s4879_s20, 0  ;;  %p5915_p6 = scmp.ne.s32.totalorder %s5908_s24, 0 }
  0x5a   : > { %p4269_p3 = scmp.lt.s32.totalorder %s4879_s20, 2  ;;  %s5930_s26 = smov (%p43_p8, %s41_s26), 0 }
  0x5b   : > { %p5069_p10 = por %p5915_p6, %p57_p2  ;;  %p59_p5 = por %p58_p13, %p57_p2 }
  0x5c   : > { %s238_s7 = sand.u32 1, %s4867_s17   ;;  %s45_s9 = ssub.s32 %s4875_s19, %s5930_s26 }
  0x5d   : > { %p48_p7 = scmp.eq.s32.totalorder %s45_s9, 0  ;;  %s4229_s8 = smul.u32 1152, %s238_s7 }
  0x5e   : > { %s4230_s10 = smul.u32 18432, %s4875_s19  ;;  %p5080_p11 = pnand %p4269_p3, %p59_p5 }
  0x5f   : > { %s5085_s24 = scalar_select %p48_p7, %s4867_s17, %s50_s14  }
  0x60   : > { %s5090_s21 = scalar_lea.hbm %s5897_s0, %s4230_s10  ;;  %s242_s22 = scalar_lea.vmem [#allocation3], %s4229_s8 }
  0x61   : > { %s252_s28 = sshll.u32 %s242_s22, 4  ;;  %s5094_s6 = scalar_lea.sflag [#allocation4], %s238_s7  ;;  %s5092_s28 = int_to_ptr.vmem [resolvable:$true] %s252_s28 }
  0x62   : > { %s4759_s29 = scalar_lea.hbm %s5090_s21, 18432  ;;  %p4761_p12 = pneg %p5080_p11 }
  0x63   : > { %p4760_p9 = scmp.ne.s32.totalorder %s5090_s21, %s4759_s29  ;;  %s4764_s9 = scalar_lea.hbm %s5897_s0, 36864 }
  0x64   : > { %p4765_p4 = scmp.lt.u32.totalorder %s5090_s21, %s5897_s0  ;;  %p4766_p2 = scmp.lt.u32.totalorder %s4764_s9, %s4759_s29 }
  0x65   : > { %p4762_p0 = pnand %p4761_p12, %p4760_p9  ;;  %p4768_p13 = scmp.lt.u32.totalorder %s4759_s29, %s5090_s21 }
  0x66   : > { %p4767_p8 = por %p4766_p2, %p4765_p4 }
  0x67   : > { %p4763_p1 = pneg %p4762_p0 }
  0x68   : > { %p4769_p6 = por %p4768_p13, %p4767_p8 }
  0x6a   : > { %p4770_p3 = pnand %p4769_p6, %p4763_p1 }
  0x6c   : > { %4773 = shalt.err (!%p4770_p3)
}
  0x6d   : > { %s4774_s7 = scalar_lea.vmem %s5092_s28, 18432  ;;  %s4886_s8 = smov [#allocation3]  }
  0x6e   : > { %p4775_p5 = scmp.ne.s32.totalorder %s5092_s28, %s4774_s7  ;;  %s4779_s13 = sshll.u32 %s4886_s8, 4  ;;  %s4780_s13 = int_to_ptr.vmem [resolvable:$false] %s4779_s13 }
  0x6f   : > { %s4781_s22 = scalar_lea.vmem %s4780_s13, 36864  ;;  %p4782_p0 = scmp.lt.s32.totalorder %s5092_s28, %s4780_s13 }
  0x70   : > { %p4777_p7 = pnand %p4775_p5, %p4761_p12  ;;  %p4783_p4 = scmp.lt.s32.totalorder %s4781_s22, %s4774_s7 }
  0x72   : > { %p4778_p9 = pneg %p4777_p7  ;;  %p4784_p2 = por %p4783_p4, %p4782_p0 }
  0x74   : > { %p4785_p8 = pnand %p4784_p2, %p4778_p9 }
  0x76   : > { %4788 = shalt.err (!%p4785_p8)
}
  0x77   : > { %s4887_s29 = smov 576   ;;  %s4888_s5 = smov 36  }
  0x78   : > { %4261 = dma.hbm_to_vmem [thread:$0]  (!%p5080_p11), %s5090_s21, 18432, %s5092_s28, %s5094_s6, %s4887_s29, %s4887_s29, %s4888_s5  }
  0x79   : > { %p5918_p12 = scmp.ne.s32.totalorder %s5912_s27, 0 }
  0x7a   : > { %s5125_s14 = sand.u32 (!%p5918_p12), 1, %s4863_s16   ;;  %p5919_p1 = scmp.ne.s32.totalorder (!%p5918_p12), %s5909_s25, 0 }
  0x7b   : > { %264 = sbr.rel (%p5918_p12) target bundleno = 716 (0x2cc), region = 36  ;;  %s267_s10 = scalar_lea.sflag (!%p5918_p12), [#allocation4], %s5125_s14 }
  0x7c   : > { %s4231_s9 = smul.u32 (!%p5918_p12), 1152, %s5125_s14 }
  0x7e   : > { %s5129_s12 = scalar_lea.vmem (!%p5918_p12), [#allocation3], %s4231_s9 }
  0x82   : > { %4842 = dma.done.wait (%p5919_p1), %s267_s10, 18432  }
  0x83   : > { %4844 = vsyncadd (%p5919_p1), %s267_s10, 4294948864  ;;  %p5920_p11 = scmp.ne.s32.totalorder %s5907_s23, 0 }
  0x85   : > { %4846 = dma.done.wait (%p5920_p11), [#allocation7], 9232  }
  0x86   : > { %4848 = vsyncadd (%p5920_p11), [#allocation7], 4294958064 }
  0x87   : > { %4850 = dma.done.wait (%p5920_p11), [#allocation10], 16  }
  0x88   : > { %4852 = vsyncadd (%p5920_p11), [#allocation10], 4294967280  ;;  %v4331_v0 = vld [vmem:[#allocation6 + $0x40] sm:$0xff]   ;;  %v4333_v2 = vld [vmem:[#allocation6 + $0x48] sm:$0xff]   ;;  %s3309_s23 = sshll.u32 %s5125_s14, 7  ;;  %s3597_s27 = sshll.u32 %s4871_s18, 11 }
  0x89   : > { %v4332_v1 = vld [vmem:[#allocation6] sm:$0xff]   ;;  %3693 = vmatprep.subr.bf16.mxu0 %v4331_v0  ;;  %4213 = vmatprep.subr.bf16.mxu1 %v4331_v0  ;;  %v4334_v3 = vld [vmem:[#allocation6 + $0x8] sm:$0xff]   ;;  %v4335_v4 = vld [vmem:[#allocation6 + $0x50] sm:$0xff]   ;;  %s5683_s25 = scalar_lea.vmem [#allocation11], %s3309_s23  ;;  %s5844_s6 = scalar_lea.hbm %s5901_s4, %s3597_s27 }
  0x8a   : > { %3694 = vmatpush3.bf16.msra.mxu0 %v4332_v1  ;;  %4221 = vmatpush3.bf16.msra.mxu1 %v4332_v1  ;;  %v4336_v5 = vld [vmem:[#allocation6 + $0x10] sm:$0xff]   ;;  %v4337_v6 = vld [vmem:[#allocation6 + $0x58] sm:$0xff]   ;;  %v4339_v8 = vld [vmem:[#allocation6 + $0x60] sm:$0xff]   ;;  %s3169_s11 = sshll.u32 %s5683_s25, 4  ;;  %s3155_s7 = scalar_lea.sflag [#allocation5], %s5125_s14  ;;  %s5846_s11 = int_to_ptr.vmem [resolvable:$true] %s3169_s11 }
  0x8b   : > { %3695 = vmatprep.subr.bf16.mxu0 %v4333_v2  ;;  %4214 = vmatprep.subr.bf16.mxu1 %v4333_v2  ;;  %v4338_v7 = vld [vmem:[#allocation6 + $0x18] sm:$0xff]   ;;  %v4340_v9 = vld [vmem:[#allocation6 + $0x20] sm:$0xff]   ;;  %v4341_v10 = vld [vmem:[#allocation6 + $0x68] sm:$0xff]   ;;  %s4789_s8 = scalar_lea.vmem %s5846_s11, 2048  ;;  %s4889_s18 = smov [#allocation11]  }
  0x8c   : > { %v4349_v11 = vld [vmem:[%s5129_s12 + $0x4] ss:$36 sps:$4 sm:$0xff]   ;;  %v4343_v14 = vld [vmem:[#allocation6 + $0x70] sm:$0xff]   ;;  %v4345_v16 = vld [vmem:[#allocation6 + $0x78] sm:$0xff]   ;;  %p4790_p13 = scmp.ne.s32.totalorder %s5846_s11, %s4789_s8  ;;  %s4793_s13 = sshll.u32 %s4889_s18, 4  ;;  %s4794_s13 = int_to_ptr.vmem [resolvable:$false] %s4793_s13 }
  0x8d   : > { %v4352_v12 = vld [vmem:[%s5129_s12 + $0x364] ss:$36 sps:$4 sm:$0xff]   ;;  %1884 = vmatprep.mubr.bf16.mxu0 %v4349_v11  ;;  %v4344_v15 = vld [vmem:[#allocation6 + $0x30] sm:$0xff]   ;;  %v4346_v17 = vld [vmem:[#allocation6 + $0x38] sm:$0xff]   ;;  %s4795_s22 = scalar_lea.vmem %s4794_s13, 4096  ;;  %p4796_p5 = scmp.lt.s32.totalorder %s5846_s11, %s4794_s13 }
  0x8e   : > { %3696 = vmatpush3.bf16.msra.mxu0 %v4334_v3  ;;  %4222 = vmatpush3.bf16.msra.mxu1 %v4334_v3  ;;  %v4342_v13 = vld [vmem:[#allocation6 + $0x28] sm:$0xff]   ;;  %v4353_v18 = vld [vmem:[#allocation6 + $0xc0] sm:$0xff]   ;;  %v4365_v31 = vld [vmem:[#allocation6 + $0xd0] sm:$0xff]   ;;  %p4791_p6 = pnand %p4790_p13, %p5069_p10  ;;  %p4797_p7 = scmp.lt.s32.totalorder %s4795_s22, %s4789_s8 }
  0x8f   : > { %3697 = vmatprep.subr.bf16.mxu0 %v4335_v4  ;;  %4215 = vmatprep.subr.bf16.mxu1 %v4335_v4  ;;  %v4347_v19 = vld [vmem:[%s5129_s12] ss:$36 sps:$4 sm:$0xff]   ;;  %v4355_v23 = vld [vmem:[#allocation6 + $0xc8] sm:$0xff]   ;;  %v4366_v32 = vld [vmem:[#allocation6 + $0x90] sm:$0xff]  }
  0x90   : > { %1980 = vmatprep.mubr.bf16.mxu1 %v4352_v12  ;;  %v4350_v20 = vld [vmem:[%s5129_s12 + $0x360] ss:$36 sps:$4 sm:$0xff]   ;;  %v4359_v25 = vld [vmem:[%s5129_s12 + $0x4c] ss:$36 sps:$4 sm:$0xff]   ;;  %v4367_v34 = vld [vmem:[#allocation6 + $0xd8] sm:$0xff]   ;;  %p4792_p3 = pneg %p4791_p6  ;;  %p4798_p9 = por %p4797_p7, %p4796_p5 }
  0x91   : > { %v4356_v21 = vld [vmem:[#allocation6 + $0x140] sm:$0xff]   ;;  %v4361_v26 = vld [vmem:[%s5129_s12 + $0x3ac] ss:$36 sps:$4 sm:$0xff]   ;;  %v4369_v35 = vld [vmem:[%s5129_s12 + $0x94] ss:$36 sps:$4 sm:$0xff]  }
  0x92   : > { %3698 = vmatpush3.bf16.msra.mxu0 %v4336_v5  ;;  %4223 = vmatpush3.bf16.msra.mxu1 %v4336_v5  ;;  %v4354_v22 = vld [vmem:[#allocation6 + $0x80] sm:$0xff]   ;;  %v4357_v27 = vld [vmem:[#allocation6 + $0x88] sm:$0xff]   ;;  %v4371_v36 = vld [vmem:[%s5129_s12 + $0x3f4] ss:$36 sps:$4 sm:$0xff]   ;;  %p4799_p0 = pnand %p4798_p9, %p4792_p3 }
  0x93   : > { %3699 = vmatprep.subr.bf16.mxu0 %v4337_v6  ;;  %4216 = vmatprep.subr.bf16.mxu1 %v4337_v6  ;;  %v4358_v24 = vld [vmem:[#allocation6 + $0x100] sm:$0xff]   ;;  %v4376_v28 = vld [vmem:[#allocation6 + $0x148] sm:$0xff]   ;;  %v4368_v37 = vld [vmem:[#allocation6 + $0x98] sm:$0xff]  }
  0x94   : > { %v4363_v29 = vld [vmem:[%s5129_s12 + $0x48] ss:$36 sps:$4 sm:$0xff]   ;;  %v4373_v38 = vld [vmem:[%s5129_s12 + $0x90] ss:$36 sps:$4 sm:$0xff]   ;;  %v4375_v40 = vld [vmem:[#allocation6 + $0xe0] sm:$0xff]  }
  0x95   : > { %v4364_v30 = vld [vmem:[%s5129_s12 + $0x3a8] ss:$36 sps:$4 sm:$0xff]   ;;  %v4374_v39 = vld [vmem:[%s5129_s12 + $0x3f0] ss:$36 sps:$4 sm:$0xff]   ;;  %v4377_v41 = vld [vmem:[#allocation6 + $0xa0] sm:$0xff]  }
  0x96   : > { %3700 = vmatpush3.bf16.msra.mxu0 %v4338_v7  ;;  %4224 = vmatpush3.bf16.msra.mxu1 %v4338_v7  ;;  %v4378_v33 = vld [vmem:[#allocation6 + $0x108] sm:$0xff]   ;;  %v4390_v43 = vld [vmem:[#allocation6 + $0x150] sm:$0xff]   ;;  %v4381_v44 = vld [vmem:[%s5129_s12 + $0xdc] ss:$36 sps:$4 sm:$0xff]  }
  0x97   : > { %3701 = vmatprep.subr.bf16.mxu0 %v4339_v8  ;;  %4217 = vmatprep.subr.bf16.mxu1 %v4339_v8  ;;  %v4379_v42 = vld [vmem:[#allocation6 + $0xe8] sm:$0xff]   ;;  %v4383_v45 = vld [vmem:[%s5129_s12 + $0x43c] ss:$36 sps:$4 sm:$0xff]   ;;  %v4392_v46 = vld [vmem:[#allocation6 + $0x110] sm:$0xff]  }
  0x98   : > { %v4380_v47 = vld [vmem:[#allocation6 + $0xa8] sm:$0xff]   ;;  %v4387_v48 = vld [vmem:[#allocation6 + $0xf0] sm:$0xff]   ;;  %v4385_v49 = vld [vmem:[%s5129_s12 + $0xd8] ss:$36 sps:$4 sm:$0xff]  }
  0x99   : > { %v4386_v50 = vld [vmem:[%s5129_s12 + $0x438] ss:$36 sps:$4 sm:$0xff]   ;;  %v4388_v51 = vld [vmem:[#allocation6 + $0xb0] sm:$0xff]   ;;  %v4393_v53 = vld [vmem:[%s5129_s12 + $0x124] ss:$36 sps:$4 sm:$0xff]  }
  0x9a   : > { %3702 = vmatpush3.bf16.msra.mxu0 %v4340_v9  ;;  %4225 = vmatpush3.bf16.msra.mxu1 %v4340_v9  ;;  %v4389_v52 = vld [vmem:[#allocation6 + $0xf8] sm:$0xff]   ;;  %v4397_v54 = vld [vmem:[%s5129_s12 + $0xc] ss:$36 sps:$4 sm:$0xff]   ;;  %v4398_v59 = vld [vmem:[%s5129_s12 + $0x120] ss:$36 sps:$4 sm:$0xff]  }
  0x9b   : > { %3703 = vmatprep.subr.bf16.mxu0 %v4341_v10  ;;  %4218 = vmatprep.subr.bf16.mxu1 %v4341_v10  ;;  %v4407_v55 = vld [vmem:[#allocation6 + $0x158] sm:$0xff]   ;;  %v4395_v58 = vld [vmem:[%s5129_s12 + $0x8] ss:$36 sps:$4 sm:$0xff]   ;;  %v4399_v60 = vld [vmem:[#allocation6 + $0x1c0] sm:$0xff]  }
  0x9c   : > { %v4408_v56 = vld [vmem:[#allocation6 + $0x118] sm:$0xff]   ;;  %v4400_v61 = vld [vmem:[#allocation6 + $0x180] sm:$0xff]   ;;  %v4401_v62 = vld [vmem:[%s5129_s12 + $0x16c] ss:$36 sps:$4 sm:$0xff]  }
  0x9d   : > { %v4391_v57 = vld [vmem:[#allocation6 + $0xb8] sm:$0xff]   ;;  %v4417_v0 = vld [vmem:[#allocation6 + $0x160] sm:$0xff]   ;;  %v4415_v1 = vld [vmem:[#allocation6 + $0x1c8] sm:$0xff]  }
  0x9e   : > { %3704 = vmatpush3.bf16.msra.mxu0 %v4342_v13  ;;  %4226 = vmatpush3.bf16.msra.mxu1 %v4342_v13  ;;  %v4403_v63 = vld [vmem:[%s5129_s12 + $0x54] ss:$36 sps:$4 sm:$0xff]   ;;  %v4418_v2 = vld [vmem:[#allocation6 + $0x120] sm:$0xff]   ;;  %v4416_v3 = vld [vmem:[#allocation6 + $0x188] sm:$0xff]  }
  0x9f   : > { %3705 = vmatprep.subr.bf16.mxu0 %v4343_v14  ;;  %4219 = vmatprep.subr.bf16.mxu1 %v4343_v14  ;;  %v4405_v4 = vld [vmem:[%s5129_s12 + $0x168] ss:$36 sps:$4 sm:$0xff]   ;;  %v4406_v5 = vld [vmem:[%s5129_s12 + $0x50] ss:$36 sps:$4 sm:$0xff]   ;;  %v4411_v7 = vld [vmem:[%s5129_s12 + $0x9c] ss:$36 sps:$4 sm:$0xff]  }
  0xa0   : > { %v4409_v6 = vld [vmem:[%s5129_s12 + $0x1b4] ss:$36 sps:$4 sm:$0xff]   ;;  %v4431_v8 = vld [vmem:[#allocation6 + $0x168] sm:$0xff]   ;;  %v4419_v14 = vld [vmem:[%s5129_s12 + $0x1fc] ss:$36 sps:$4 sm:$0xff]  }
  0xa1   : > { %v4432_v9 = vld [vmem:[#allocation6 + $0x1d0] sm:$0xff]   ;;  %v4433_v10 = vld [vmem:[#allocation6 + $0x128] sm:$0xff]   ;;  %v4414_v13 = vld [vmem:[%s5129_s12 + $0x98] ss:$36 sps:$4 sm:$0xff]  }
  0xa2   : > { %3706 = vmatpush3.bf16.msra.mxu0 %v4344_v15  ;;  %4227 = vmatpush3.bf16.msra.mxu1 %v4344_v15  ;;  %v4434_v11 = vld [vmem:[#allocation6 + $0x190] sm:$0xff]  }
  0xa3   : > { %3707 = vmatprep.subr.bf16.mxu0 %v4345_v16  ;;  %4220 = vmatprep.subr.bf16.mxu1 %v4345_v16  ;;  %v4413_v12 = vld [vmem:[%s5129_s12 + $0x1b0] ss:$36 sps:$4 sm:$0xff]  }
  0xa4   : > { %v4441_v15 = vld [vmem:[#allocation6 + $0x170] sm:$0xff]  }
  0xa5   : > { %v4442_v16 = vld [vmem:[#allocation6 + $0x130] sm:$0xff]  }
  0xa6   : > { %3708 = vmatpush3.bf16.msra.mxu0 %v4346_v17  ;;  %4228 = vmatpush3.bf16.msra.mxu1 %v4346_v17  ;;  %v4421_v17 = vld [vmem:[%s5129_s12 + $0xe4] ss:$36 sps:$4 sm:$0xff]  }
  0xa7   : > { %3805 = vmatprep.subr.bf16.mxu1 %v4353_v18  ;;  %3917 = vmatprep.subr.bf16.mxu0 %v4356_v21  ;;  %v4449_v18 = vld [vmem:[#allocation6 + $0x1d8] sm:$0xff]   ;;  %v4424_v21 = vld [vmem:[%s5129_s12 + $0xe0] ss:$36 sps:$4 sm:$0xff]  }
  0xa9   : > { %1885 = vmatmul.mubr.bf16.vlgmr.msra.gmra.mrb[0].mxu0 %v4347_v19  ;;  %1981 = vmatmul.mubr.bf16.vlgmr.msra.gmra.mrb[0].mxu1 %v4350_v20  ;;  %v4450_v19 = vld [vmem:[#allocation6 + $0x198] sm:$0xff]  }
  0xaa   : > { %3806 = vmatpush3.bf16.msra.mxu1 %v4354_v22  ;;  %3918 = vmatpush3.bf16.msra.mxu0 %v4358_v24  ;;  %v4423_v20 = vld [vmem:[%s5129_s12 + $0x1f8] ss:$36 sps:$4 sm:$0xff]   ;;  %v4425_v22 = vld [vmem:[%s5129_s12 + $0x244] ss:$36 sps:$4 sm:$0xff]  }
  0xab   : > { %3807 = vmatprep.subr.bf16.mxu1 %v4355_v23  ;;  %1892 = vmatprep.mubr.bf16.mxu0 %v4359_v25  ;;  %v4427_v23 = vld [vmem:[%s5129_s12 + $0x12c] ss:$36 sps:$4 sm:$0xff]   ;;  %v4457_v24 = vld [vmem:[#allocation6 + $0x178] sm:$0xff]  }
  0xac   : > { %1988 = vmatprep.mubr.bf16.mxu1 %v4361_v26  ;;  %3919 = vmatprep.subr.bf16.mxu0 %v4376_v28  ;;  %v4458_v25 = vld [vmem:[#allocation6 + $0x138] sm:$0xff]   ;;  %v4465_v26 = vld [vmem:[#allocation6 + $0x1e0] sm:$0xff]  }
  0xad   : > { %v4466_v28 = vld [vmem:[#allocation6 + $0x1a0] sm:$0xff]  }
  0xae   : > { %3808 = vmatpush3.bf16.msra.mxu1 %v4357_v27  ;;  %3920 = vmatpush3.bf16.msra.mxu0 %v4378_v33  ;;  %v4429_v27 = vld [vmem:[%s5129_s12 + $0x240] ss:$36 sps:$4 sm:$0xff]   ;;  %v4480_v33 = vld [vmem:[#allocation6 + $0x1e8] sm:$0xff]  }
  0xaf   : > { %3809 = vmatprep.subr.bf16.mxu1 %v4365_v31  ;;  %3921 = vmatprep.subr.bf16.mxu0 %v4390_v43  ;;  %v4435_v31 = vld [vmem:[%s5129_s12 + $0x28c] ss:$36 sps:$4 sm:$0xff]   ;;  %v4451_v43 = vld [vmem:[%s5129_s12 + $0x31c] ss:$36 sps:$4 sm:$0xff]  }
  0xb1   : > { %1893 = vmatmul.mubr.bf16.gmra.mrb[4].mxu0 %v4363_v29  ;;  %1989 = vmatmul.mubr.bf16.gmra.mrb[4].mxu1 %v4364_v30  ;;  %v4467_v29 = vld [vmem:[#allocation6 + $0x200] sm:$0xff]   ;;  %v4430_v30 = vld [vmem:[%s5129_s12 + $0x128] ss:$36 sps:$4 sm:$0xff]  }
  0xb2   : > { %3810 = vmatpush3.bf16.msra.mxu1 %v4366_v32  ;;  %1900 = vmatprep.mubr.bf16.mxu0 %v4369_v35  ;;  %v4437_v32 = vld [vmem:[%s5129_s12 + $0x174] ss:$36 sps:$4 sm:$0xff]   ;;  %v4481_v35 = vld [vmem:[#allocation6 + $0x1a8] sm:$0xff]  }
  0xb3   : > { %3811 = vmatprep.subr.bf16.mxu1 %v4367_v34  ;;  %1996 = vmatprep.mubr.bf16.mxu1 %v4371_v36  ;;  %v4439_v34 = vld [vmem:[%s5129_s12 + $0x288] ss:$36 sps:$4 sm:$0xff]   ;;  %v4440_v36 = vld [vmem:[%s5129_s12 + $0x170] ss:$36 sps:$4 sm:$0xff]  }
  0xb4   : > { %3922 = vmatpush3.bf16.msra.mxu0 %v4392_v46  ;;  %v4456_v46 = vld [vmem:[%s5129_s12 + $0x200] ss:$36 sps:$4 sm:$0xff]  }
  0xb5   : > { %3923 = vmatprep.subr.bf16.mxu0 %v4407_v55  ;;  %v4482_v55 = vld [vmem:[#allocation6 + $0x208] sm:$0xff]  }
  0xb6   : > { %3812 = vmatpush3.bf16.msra.mxu1 %v4368_v37  ;;  %v4443_v37 = vld [vmem:[%s5129_s12 + $0x2d4] ss:$36 sps:$4 sm:$0xff]  }
  0xb7   : > { %3813 = vmatprep.subr.bf16.mxu1 %v4375_v40  ;;  %v4448_v40 = vld [vmem:[%s5129_s12 + $0x1b8] ss:$36 sps:$4 sm:$0xff]  }
  0xb8   : > { %3924 = vmatpush3.bf16.msra.mxu0 %v4408_v56  ;;  %v4497_v56 = vld [vmem:[#allocation6 + $0x210] sm:$0xff]  }
  0xb9   : > { %1901 = vmatmul.mubr.bf16.gmra.mrb[8].mxu0 %v4373_v38  ;;  %1997 = vmatmul.mubr.bf16.gmra.mrb[8].mxu1 %v4374_v39  ;;  %v4445_v38 = vld [vmem:[%s5129_s12 + $0x1bc] ss:$36 sps:$4 sm:$0xff]   ;;  %v4447_v39 = vld [vmem:[%s5129_s12 + $0x2d0] ss:$36 sps:$4 sm:$0xff]  }
  0xba   : > { %3814 = vmatpush3.bf16.msra.mxu1 %v4377_v41  ;;  %1908 = vmatprep.mubr.bf16.mxu0 %v4381_v44  ;;  %v4495_v41 = vld [vmem:[#allocation6 + $0x1f0] sm:$0xff]   ;;  %v4453_v44 = vld [vmem:[%s5129_s12 + $0x204] ss:$36 sps:$4 sm:$0xff]  }
  0xbb   : > { %3815 = vmatprep.subr.bf16.mxu1 %v4379_v42  ;;  %2004 = vmatprep.mubr.bf16.mxu1 %v4383_v45  ;;  %v4496_v42 = vld [vmem:[#allocation6 + $0x1b0] sm:$0xff]   ;;  %v4455_v45 = vld [vmem:[%s5129_s12 + $0x318] ss:$36 sps:$4 sm:$0xff]  }
  0xbc   : > { %3925 = vmatprep.subr.bf16.mxu0 %v4417_v0  ;;  %v4479_v0 = vld [vmem:[%s5129_s12 + $0xa0] ss:$36 sps:$4 sm:$0xff]  }
  0xbd   : > { %3926 = vmatpush3.bf16.msra.mxu0 %v4418_v2  ;;  %v4485_v2 = vld [vmem:[%s5129_s12 + $0xec] ss:$36 sps:$4 sm:$0xff]  }
  0xbe   : > { %3816 = vmatpush3.bf16.msra.mxu1 %v4380_v47  ;;  %3927 = vmatprep.subr.bf16.mxu0 %v4431_v8  ;;  %v4510_v47 = vld [vmem:[#allocation6 + $0x1f8] sm:$0xff]  }
  0xbf   : > { %3817 = vmatprep.subr.bf16.mxu1 %v4387_v48  ;;  %v4511_v48 = vld [vmem:[#allocation6 + $0x1b8] sm:$0xff]  }
  0xc0   : > { %v4491_v8 = vld [vmem:[%s5129_s12 + $0x134] ss:$36 sps:$4 sm:$0xff]  }
  0xc1   : > { %1909 = vmatmul.mubr.bf16.gmra.mrb[12].mxu0 %v4385_v49  ;;  %2005 = vmatmul.mubr.bf16.gmra.mrb[12].mxu1 %v4386_v50  ;;  %v4459_v49 = vld [vmem:[%s5129_s12 + $0x24c] ss:$36 sps:$4 sm:$0xff]   ;;  %v4463_v50 = vld [vmem:[%s5129_s12 + $0x14] ss:$36 sps:$4 sm:$0xff]  }
  0xc2   : > { %3818 = vmatpush3.bf16.msra.mxu1 %v4388_v51  ;;  %1916 = vmatprep.mubr.bf16.mxu0 %v4393_v53  ;;  %v4461_v51 = vld [vmem:[%s5129_s12 + $0x10] ss:$36 sps:$4 sm:$0xff]  }
  0xc3   : > { %3819 = vmatprep.subr.bf16.mxu1 %v4389_v52  ;;  %2045 = vmatprep.mubr.bf16.mxu1 %v4397_v54  ;;  %v4464_v52 = vld [vmem:[%s5129_s12 + $0x248] ss:$36 sps:$4 sm:$0xff]   ;;  %v4468_v53 = vld [vmem:[%s5129_s12 + $0x294] ss:$36 sps:$4 sm:$0xff]   ;;  %v4470_v54 = vld [vmem:[%s5129_s12 + $0x5c] ss:$36 sps:$4 sm:$0xff]  }
  0xc4   : > { %3928 = vmatpush3.bf16.msra.mxu0 %v4433_v10  ;;  %v4493_v10 = vld [vmem:[%s5129_s12 + $0x368] ss:$36 sps:$4 sm:$0xff]  }
  0xc5   : > { %3929 = vmatprep.subr.bf16.mxu0 %v4441_v15  ;;  %v4503_v15 = vld [vmem:[%s5129_s12 + $0x178] ss:$36 sps:$4 sm:$0xff]  }
  0xc6   : > { %3820 = vmatpush3.bf16.msra.mxu1 %v4391_v57  ;;  %v4472_v57 = vld [vmem:[%s5129_s12 + $0x290] ss:$36 sps:$4 sm:$0xff]  }
  0xc7   : > { %4029 = vmatprep.subr.bf16.mxu1 %v4399_v60  ;;  %v4476_v60 = vld [vmem:[%s5129_s12 + $0xa4] ss:$36 sps:$4 sm:$0xff]  }
  0xc8   : > { %3930 = vmatpush3.bf16.msra.mxu0 %v4442_v16  ;;  %v4504_v16 = vld [vmem:[%s5129_s12 + $0x3fc] ss:$36 sps:$4 sm:$0xff]  }
  0xc9   : > { %1917 = vmatmul.mubr.bf16.gmra.mrb[16].mxu0 %v4398_v59  ;;  %2046 = vmatmul.mubr.bf16.vlgmr.msra.gmra.mrb[16].mxu1 %v4395_v58  ;;  %v4473_v58 = vld [vmem:[%s5129_s12 + $0x58] ss:$36 sps:$4 sm:$0xff]  }
  0xca   : > { %4030 = vmatpush3.bf16.msra.mxu1 %v4400_v61  ;;  %1924 = vmatprep.mubr.bf16.mxu0 %v4401_v62  ;;  %v4474_v59 = vld [vmem:[%s5129_s12 + $0x2dc] ss:$36 sps:$4 sm:$0xff]  }
  0xcb   : > { %2053 = vmatprep.mubr.bf16.mxu1 %v4403_v63  ;;  %4031 = vmatprep.subr.bf16.mxu1 %v4415_v1  ;;  %v4512_v61 = vld [vmem:[#allocation6 + $0x218] sm:$0xff]   ;;  %v4525_v62 = vld [vmem:[#allocation6 + $0x220] sm:$0xff]  }
  0xcc   : > { %3931 = vmatprep.subr.bf16.mxu0 %v4457_v24  ;;  %v4478_v63 = vld [vmem:[%s5129_s12 + $0x2d8] ss:$36 sps:$4 sm:$0xff]   ;;  %v4483_v1 = vld [vmem:[%s5129_s12 + $0x324] ss:$36 sps:$4 sm:$0xff]  }
  0xcd   : > { %3932 = vmatpush3.bf16.msra.mxu0 %v4458_v25  ;;  %v4519_v24 = vld [vmem:[%s5129_s12 + $0x254] ss:$36 sps:$4 sm:$0xff]   ;;  %v4523_v25 = vld [vmem:[%s5129_s12 + $0x1c] ss:$36 sps:$4 sm:$0xff]  }
  0xce   : > { %4032 = vmatpush3.bf16.msra.mxu1 %v4416_v3  ;;  %4165 = vmatprep.subr.bf16.mxu0 %v4467_v29  ;;  %v4538_v3 = vld [vmem:[#allocation6 + $0x228] sm:$0xff]  }
  0xcf   : > { %4033 = vmatprep.subr.bf16.mxu1 %v4432_v9  ;;  %v4564_v9 = vld [vmem:[#allocation6 + $0x238] sm:$0xff]  }
  0xd1   : > { %1925 = vmatmul.mubr.bf16.gmra.mrb[20].mxu0 %v4405_v4  ;;  %2054 = vmatmul.mubr.bf16.gmra.mrb[20].mxu1 %v4406_v5  ;;  %v4487_v4 = vld [vmem:[%s5129_s12 + $0x320] ss:$36 sps:$4 sm:$0xff]   ;;  %v4488_v5 = vld [vmem:[%s5129_s12 + $0xe8] ss:$36 sps:$4 sm:$0xff]  }
  0xd2   : > { %1932 = vmatprep.mubr.bf16.mxu0 %v4409_v6  ;;  %2061 = vmatprep.mubr.bf16.mxu1 %v4411_v7  ;;  %v4551_v6 = vld [vmem:[#allocation6 + $0x230] sm:$0xff]  }
  0xd3   : > { %4034 = vmatpush3.bf16.msra.mxu1 %v4434_v11  ;;  %v4489_v7 = vld [vmem:[%s5129_s12 + $0x36c] ss:$36 sps:$4 sm:$0xff]  }
  0xd4   : > { %4035 = vmatprep.subr.bf16.mxu1 %v4449_v18  ;;  %v4494_v11 = vld [vmem:[%s5129_s12 + $0x130] ss:$36 sps:$4 sm:$0xff]   ;;  %v4508_v18 = vld [vmem:[%s5129_s12 + $0x3f8] ss:$36 sps:$4 sm:$0xff]  }
  0xd7   : > { %4036 = vmatpush3.bf16.msra.mxu1 %v4450_v19  ;;  %v4509_v19 = vld [vmem:[%s5129_s12 + $0x1c0] ss:$36 sps:$4 sm:$0xff]  }
  0xd8   : > { %4037 = vmatprep.subr.bf16.mxu1 %v4465_v26  ;;  %v4521_v26 = vld [vmem:[%s5129_s12 + $0x18] ss:$36 sps:$4 sm:$0xff]  }
  0xd9   : > { %1933 = vmatmul.mubr.bf16.gmra.mrb[24].mxu0 %v4413_v12  ;;  %2062 = vmatmul.mubr.bf16.gmra.mrb[24].mxu1 %v4414_v13  ;;  %v4498_v12 = vld [vmem:[%s5129_s12 + $0x3b4] ss:$36 sps:$4 sm:$0xff]   ;;  %v4500_v13 = vld [vmem:[%s5129_s12 + $0x17c] ss:$36 sps:$4 sm:$0xff]  }
  0xda   : > { %1940 = vmatprep.mubr.bf16.mxu0 %v4419_v14  ;;  %2069 = vmatprep.mubr.bf16.mxu1 %v4421_v17  ;;  %v4502_v14 = vld [vmem:[%s5129_s12 + $0x3b0] ss:$36 sps:$4 sm:$0xff]   ;;  %v4506_v17 = vld [vmem:[%s5129_s12 + $0x1c4] ss:$36 sps:$4 sm:$0xff]  }
  0xdb   : > { %4038 = vmatpush3.bf16.msra.mxu1 %v4466_v28  ;;  %v4526_v28 = vld [vmem:[%s5129_s12 + $0x29c] ss:$36 sps:$4 sm:$0xff]  }
  0xdc   : > { %4039 = vmatprep.subr.bf16.mxu1 %v4480_v33  ;;  %v4534_v33 = vld [vmem:[%s5129_s12 + $0xac] ss:$36 sps:$4 sm:$0xff]  }
  0xdf   : > { %4040 = vmatpush3.bf16.msra.mxu1 %v4481_v35  ;;  %v4537_v35 = vld [vmem:[%s5129_s12 + $0xa8] ss:$36 sps:$4 sm:$0xff]  }
  0xe0   : > { %4041 = vmatprep.subr.bf16.mxu1 %v4495_v41  ;;  %v4547_v41 = vld [vmem:[%s5129_s12 + $0x13c] ss:$36 sps:$4 sm:$0xff]  }
  0xe1   : > { %1941 = vmatmul.mubr.bf16.gmra.mrb[28].mxu0 %v4423_v20  ;;  %2070 = vmatmul.mubr.bf16.gmra.mrb[28].mxu1 %v4424_v21  ;;  %v4513_v20 = vld [vmem:[%s5129_s12 + $0x444] ss:$36 sps:$4 sm:$0xff]   ;;  %v4515_v21 = vld [vmem:[%s5129_s12 + $0x20c] ss:$36 sps:$4 sm:$0xff]  }
  0xe2   : > { %1948 = vmatprep.mubr.bf16.mxu0 %v4425_v22  ;;  %2077 = vmatprep.mubr.bf16.mxu1 %v4427_v23  ;;  %v4517_v22 = vld [vmem:[%s5129_s12 + $0x440] ss:$36 sps:$4 sm:$0xff]   ;;  %v4518_v23 = vld [vmem:[%s5129_s12 + $0x208] ss:$36 sps:$4 sm:$0xff]  }
  0xe3   : > { %4042 = vmatpush3.bf16.msra.mxu1 %v4496_v42  ;;  %v4549_v42 = vld [vmem:[%s5129_s12 + $0x370] ss:$36 sps:$4 sm:$0xff]  }
  0xe4   : > { %4043 = vmatprep.subr.bf16.mxu1 %v4510_v47  ;;  %v4557_v47 = vld [vmem:[%s5129_s12 + $0x180] ss:$36 sps:$4 sm:$0xff]  }
  0xe7   : > { %4044 = vmatpush3.bf16.msra.mxu1 %v4511_v48  ;;  %v4558_v48 = vld [vmem:[%s5129_s12 + $0x404] ss:$36 sps:$4 sm:$0xff]  }
  0xe9   : > { %1949 = vmatmul.mubr.bf16.gmra.mrb[32].mxu0 %v4429_v27  ;;  %2078 = vmatmul.mubr.bf16.gmra.mrb[32].mxu1 %v4430_v30  ;;  %v4524_v27 = vld [vmem:[%s5129_s12 + $0x250] ss:$36 sps:$4 sm:$0xff]   ;;  %v4530_v30 = vld [vmem:[%s5129_s12 + $0x298] ss:$36 sps:$4 sm:$0xff]  }
  0xea   : > { %1956 = vmatprep.mubr.bf16.mxu0 %v4435_v31  ;;  %2085 = vmatprep.mubr.bf16.mxu1 %v4437_v32  ;;  %v4531_v31 = vld [vmem:[%s5129_s12 + $0x60] ss:$36 sps:$4 sm:$0xff]  }
  0xeb   : > { %v4532_v32 = vld [vmem:[%s5129_s12 + $0x2e4] ss:$36 sps:$4 sm:$0xff]  }
  0xf1   : > { %1957 = vmatmul.mubr.bf16.gmra.mrb[36].mxu0 %v4439_v34  ;;  %2086 = vmatmul.mubr.bf16.gmra.mrb[36].mxu1 %v4440_v36  ;;  %v4536_v34 = vld [vmem:[%s5129_s12 + $0x2e0] ss:$36 sps:$4 sm:$0xff]   ;;  %v4539_v36 = vld [vmem:[%s5129_s12 + $0x32c] ss:$36 sps:$4 sm:$0xff]  }
  0xf2   : > { %1964 = vmatprep.mubr.bf16.mxu0 %v4443_v37  ;;  %2093 = vmatprep.mubr.bf16.mxu1 %v4445_v38  ;;  %v4541_v37 = vld [vmem:[%s5129_s12 + $0xf4] ss:$36 sps:$4 sm:$0xff]   ;;  %v4543_v38 = vld [vmem:[%s5129_s12 + $0x328] ss:$36 sps:$4 sm:$0xff]  }
  0xf9   : > { %1965 = vmatmul.mubr.bf16.gmra.mrb[40].mxu0 %v4447_v39  ;;  %2094 = vmatmul.mubr.bf16.gmra.mrb[40].mxu1 %v4448_v40  ;;  %v4544_v39 = vld [vmem:[%s5129_s12 + $0xf0] ss:$36 sps:$4 sm:$0xff]  }
  0xfa   : > { %1972 = vmatprep.mubr.bf16.mxu0 %v4451_v43  ;;  %2101 = vmatprep.mubr.bf16.mxu1 %v4453_v44  ;;  %v4545_v40 = vld [vmem:[%s5129_s12 + $0x374] ss:$36 sps:$4 sm:$0xff]   ;;  %v4552_v44 = vld [vmem:[%s5129_s12 + $0x3bc] ss:$36 sps:$4 sm:$0xff]  }
  0xfb   : > { %v4550_v43 = vld [vmem:[%s5129_s12 + $0x138] ss:$36 sps:$4 sm:$0xff]  }
 0x101   : > { %1973 = vmatmul.mubr.bf16.gmra.mrb[44].mxu0 %v4455_v45  ;;  %2102 = vmatmul.mubr.bf16.gmra.mrb[44].mxu1 %v4456_v46  ;;  %v4554_v45 = vld [vmem:[%s5129_s12 + $0x184] ss:$36 sps:$4 sm:$0xff]   ;;  %v4556_v46 = vld [vmem:[%s5129_s12 + $0x3b8] ss:$36 sps:$4 sm:$0xff]  }
 0x102   : > { %2109 = vmatprep.mubr.bf16.mxu1 %v4459_v49  ;;  %2206 = vmatprep.mubr.bf16.mxu0 %v4463_v50  ;;  %v4560_v49 = vld [vmem:[%s5129_s12 + $0x1cc] ss:$36 sps:$4 sm:$0xff]   ;;  %v4562_v50 = vld [vmem:[%s5129_s12 + $0x400] ss:$36 sps:$4 sm:$0xff]  }
 0x109   : > { %2110 = vmatmul.mubr.bf16.gmra.mrb[48].mxu1 %v4464_v52  ;;  %2207 = vmatmul.mubr.bf16.vlgmr.msra.gmra.mrb[48].mxu0 %v4461_v51  ;;  %v4563_v51 = vld [vmem:[%s5129_s12 + $0x1c8] ss:$36 sps:$4 sm:$0xff]  }
 0x10a   : > { %4166 = vmatpush3.bf16.msra.mxu0 %v4467_v29  ;;  %2117 = vmatprep.mubr.bf16.mxu1 %v4468_v53  ;;  %v4528_v29 = vld [vmem:[%s5129_s12 + $0x64] ss:$36 sps:$4 sm:$0xff]   ;;  %v4565_v52 = vld [vmem:[%s5129_s12 + $0x44c] ss:$36 sps:$4 sm:$0xff]   ;;  %v4567_v53 = vld [vmem:[%s5129_s12 + $0x214] ss:$36 sps:$4 sm:$0xff]  }
 0x10b   : > { %2214 = vmatprep.mubr.bf16.mxu0 %v4470_v54  ;;  %4167 = vmatprep.subr.bf16.mxu0 %v4482_v55 }
 0x10e   : > { %4168 = vmatpush3.bf16.msra.mxu0 %v4482_v55 }
 0x10f   : > { %4169 = vmatprep.subr.bf16.mxu0 %v4497_v56 }
 0x111   : > { %2118 = vmatmul.mubr.bf16.gmra.mrb[52].mxu1 %v4472_v57  ;;  %2215 = vmatmul.mubr.bf16.gmra.mrb[52].mxu0 %v4473_v58  ;;  %v4569_v58 = vld [vmem:[%s5129_s12 + $0x448] ss:$36 sps:$4 sm:$0xff]  }
 0x112   : > { %2125 = vmatprep.mubr.bf16.mxu1 %v4474_v59  ;;  %2222 = vmatprep.mubr.bf16.mxu0 %v4476_v60  ;;  %v4570_v59 = vld [vmem:[%s5129_s12 + $0x210] ss:$36 sps:$4 sm:$0xff]  }
 0x113   : > { %4170 = vmatpush3.bf16.msra.mxu0 %v4497_v56 }
 0x114   : > { %4171 = vmatprep.subr.bf16.mxu0 %v4512_v61 }
 0x117   : > { %4172 = vmatpush3.bf16.msra.mxu0 %v4512_v61 }
 0x118   : > { %4173 = vmatprep.subr.bf16.mxu0 %v4525_v62 }
 0x119   : > { %2126 = vmatmul.mubr.bf16.gmra.mrb[56].mxu1 %v4478_v63  ;;  %2223 = vmatmul.mubr.bf16.gmra.mrb[56].mxu0 %v4479_v0  ;;  %v4571_v0 = vld [vmem:[%s5129_s12 + $0x25c] ss:$36 sps:$4 sm:$0xff]  }
 0x11a   : > { %2133 = vmatprep.mubr.bf16.mxu1 %v4483_v1  ;;  %2230 = vmatprep.mubr.bf16.mxu0 %v4485_v2  ;;  %v4573_v1 = vld [vmem:[%s5129_s12 + $0x20] ss:$36 sps:$4 sm:$0xff]  }
 0x11b   : > { %4174 = vmatpush3.bf16.msra.mxu0 %v4525_v62 }
 0x11c   : > { %4175 = vmatprep.subr.bf16.mxu0 %v4538_v3 }
 0x11f   : > { %4176 = vmatpush3.bf16.msra.mxu0 %v4538_v3 }
 0x120   : > { %4177 = vmatprep.subr.bf16.mxu0 %v4551_v6 }
 0x121   : > { %2134 = vmatmul.mubr.bf16.gmra.mrb[60].mxu1 %v4487_v4  ;;  %2231 = vmatmul.mubr.bf16.gmra.mrb[60].mxu0 %v4488_v5 }
 0x122   : > { %2141 = vmatprep.mubr.bf16.mxu1 %v4489_v7  ;;  %2238 = vmatprep.mubr.bf16.mxu0 %v4491_v8 }
 0x123   : > { %4178 = vmatpush3.bf16.msra.mxu0 %v4551_v6 }
 0x124   : > { %4179 = vmatprep.subr.bf16.mxu0 %v4564_v9 }
 0x127   : > { %4180 = vmatpush3.bf16.msra.mxu0 %v4564_v9 }
 0x129   : > { %2142 = vmatmul.mubr.bf16.gmra.mrb[64].mxu1 %v4493_v10  ;;  %2239 = vmatmul.mubr.bf16.gmra.mrb[64].mxu0 %v4494_v11  ;;  %v4574_v10 = vld [vmem:[%s5129_s12 + $0x258] ss:$36 sps:$4 sm:$0xff]   ;;  %v4575_v11 = vld [vmem:[%s5129_s12 + $0x68] ss:$36 sps:$4 sm:$0xff]  }
 0x12a   : > { %2149 = vmatprep.mubr.bf16.mxu1 %v4498_v12  ;;  %2246 = vmatprep.mubr.bf16.mxu0 %v4500_v13 }
 0x131   : > { %2150 = vmatmul.mubr.bf16.gmra.mrb[68].mxu1 %v4502_v14  ;;  %2247 = vmatmul.mubr.bf16.gmra.mrb[68].mxu0 %v4503_v15 }
 0x132   : > { %2157 = vmatprep.mubr.bf16.mxu1 %v4504_v16  ;;  %2254 = vmatprep.mubr.bf16.mxu0 %v4506_v17  ;;  %v4576_v16 = vld [vmem:[%s5129_s12 + $0x2a4] ss:$36 sps:$4 sm:$0xff]   ;;  %v4578_v17 = vld [vmem:[%s5129_s12 + $0xb0] ss:$36 sps:$4 sm:$0xff]  }
 0x139   : > { %2158 = vmatmul.mubr.bf16.gmra.mrb[72].mxu1 %v4508_v18  ;;  %2255 = vmatmul.mubr.bf16.gmra.mrb[72].mxu0 %v4509_v19 }
 0x13a   : > { %2165 = vmatprep.mubr.bf16.mxu1 %v4513_v20  ;;  %2262 = vmatprep.mubr.bf16.mxu0 %v4515_v21 }
 0x141   : > { %2166 = vmatmul.mubr.bf16.gmra.mrb[76].mxu1 %v4517_v22  ;;  %2263 = vmatmul.mubr.bf16.gmra.mrb[76].mxu0 %v4518_v23 }
 0x142   : > { %2270 = vmatprep.mubr.bf16.mxu0 %v4519_v24  ;;  %2367 = vmatprep.mubr.bf16.mxu1 %v4523_v25 }
 0x149   : > { %2271 = vmatmul.mubr.bf16.gmra.mrb[80].mxu0 %v4524_v27  ;;  %2368 = vmatmul.mubr.bf16.vlgmr.msra.gmra.mrb[80].mxu1 %v4521_v26  ;;  %v4579_v26 = vld [vmem:[%s5129_s12 + $0x2a0] ss:$36 sps:$4 sm:$0xff]   ;;  %v4580_v27 = vld [vmem:[%s5129_s12 + $0xf8] ss:$36 sps:$4 sm:$0xff]  }
 0x14a   : > { %2278 = vmatprep.mubr.bf16.mxu0 %v4526_v28  ;;  %2375 = vmatprep.mubr.bf16.mxu1 %v4528_v29 }
 0x151   : > { %2279 = vmatmul.mubr.bf16.gmra.mrb[84].mxu0 %v4530_v30  ;;  %2376 = vmatmul.mubr.bf16.gmra.mrb[84].mxu1 %v4531_v31 }
 0x152   : > { %2286 = vmatprep.mubr.bf16.mxu0 %v4532_v32  ;;  %2383 = vmatprep.mubr.bf16.mxu1 %v4534_v33  ;;  %v4581_v32 = vld [vmem:[%s5129_s12 + $0x2ec] ss:$36 sps:$4 sm:$0xff]   ;;  %v4583_v33 = vld [vmem:[%s5129_s12 + $0x140] ss:$36 sps:$4 sm:$0xff]  }
 0x159   : > { %2287 = vmatmul.mubr.bf16.gmra.mrb[88].mxu0 %v4536_v34  ;;  %2384 = vmatmul.mubr.bf16.gmra.mrb[88].mxu1 %v4537_v35 }
 0x15a   : > { %2294 = vmatprep.mubr.bf16.mxu0 %v4539_v36  ;;  %2391 = vmatprep.mubr.bf16.mxu1 %v4541_v37 }
 0x161   : > { %2295 = vmatmul.mubr.bf16.gmra.mrb[92].mxu0 %v4543_v38  ;;  %2392 = vmatmul.mubr.bf16.gmra.mrb[92].mxu1 %v4544_v39 }
 0x162   : > { %2302 = vmatprep.mubr.bf16.mxu0 %v4545_v40  ;;  %2399 = vmatprep.mubr.bf16.mxu1 %v4547_v41 }
 0x169   : > { %2303 = vmatmul.mubr.bf16.gmra.mrb[96].mxu0 %v4549_v42  ;;  %2400 = vmatmul.mubr.bf16.gmra.mrb[96].mxu1 %v4550_v43  ;;  %v4584_v42 = vld [vmem:[%s5129_s12 + $0x2e8] ss:$36 sps:$4 sm:$0xff]  }
 0x16a   : > { %2310 = vmatprep.mubr.bf16.mxu0 %v4552_v44  ;;  %2407 = vmatprep.mubr.bf16.mxu1 %v4554_v45  ;;  %v4585_v43 = vld [vmem:[%s5129_s12 + $0x188] ss:$36 sps:$4 sm:$0xff]  }
 0x171   : > { %2311 = vmatmul.mubr.bf16.gmra.mrb[100].mxu0 %v4556_v46  ;;  %2408 = vmatmul.mubr.bf16.gmra.mrb[100].mxu1 %v4557_v47 }
 0x172   : > { %2318 = vmatprep.mubr.bf16.mxu0 %v4558_v48  ;;  %2415 = vmatprep.mubr.bf16.mxu1 %v4560_v49  ;;  %v4586_v48 = vld [vmem:[%s5129_s12 + $0x334] ss:$36 sps:$4 sm:$0xff]  }
 0x173   : > { %v4588_v49 = vld [vmem:[%s5129_s12 + $0x1d0] ss:$36 sps:$4 sm:$0xff]  }
 0x179   : > { %2319 = vmatmul.mubr.bf16.gmra.mrb[104].mxu0 %v4562_v50  ;;  %2416 = vmatmul.mubr.bf16.gmra.mrb[104].mxu1 %v4563_v51 }
 0x17a   : > { %2326 = vmatprep.mubr.bf16.mxu0 %v4565_v52  ;;  %2423 = vmatprep.mubr.bf16.mxu1 %v4567_v53 }
 0x17c   : > { %v3781_v54 = vpop.f32.mrb[0].mxu1  ;;  %v3709_v55 = vpop.f32.mrb[0].mxu0 }
 0x17d   : > { %v3782_v56 = vpop.f32.mrb[1].mxu1  ;;  %v3710_v57 = vpop.f32.mrb[1].mxu0 }
 0x17e   : > { %v5255_v60 = vadd.f32 %v3782_v56, %v3781_v54  ;;  %v3784_v61 = vpop.f32.mrb[2].mxu1  ;;  %v5257_v62 = vadd.f32 %v3710_v57, %v3709_v55  ;;  %v3712_v63 = vpop.f32.mrb[2].mxu0 }
 0x17f   : > { %v3785_v2 = vpop.f32.mrb[3].mxu1  ;;  %v3713_v3 = vpop.f32.mrb[3].mxu0 }
 0x180   : > { %v5261_v4 = vadd.f32 %v3785_v2, %v3784_v61  ;;  %v5263_v5 = vadd.f32 %v3713_v3, %v3712_v63  ;;  %v4591_v2 = vld [vmem:[%s5129_s12 + $0x37c] ss:$36 sps:$4 sm:$0xff]  }
 0x181   : > { %2327 = vmatmul.mubr.bf16.gmra.mrb[108].mxu0 %v4569_v58  ;;  %2424 = vmatmul.mubr.bf16.gmra.mrb[108].mxu1 %v4570_v59  ;;  %v4589_v58 = vld [vmem:[%s5129_s12 + $0x330] ss:$36 sps:$4 sm:$0xff]   ;;  %v4590_v59 = vld [vmem:[%s5129_s12 + $0x218] ss:$36 sps:$4 sm:$0xff]   ;;  %v4593_v3 = vld [vmem:[%s5129_s12 + $0x260] ss:$36 sps:$4 sm:$0xff]  }
 0x182   : > { %2431 = vmatprep.mubr.bf16.mxu1 %v4571_v0  ;;  %4181 = vmatprep.mubr.bf16.mxu0 %v4573_v1 }
 0x184   : > { %v3787_v6 = vpop.f32.mrb[4].mxu1  ;;  %v3715_v7 = vpop.f32.mrb[4].mxu0 }
 0x185   : > { %v3788_v8 = vpop.f32.mrb[5].mxu1  ;;  %v3716_v9 = vpop.f32.mrb[5].mxu0 }
 0x186   : > { %v5267_v12 = vadd.f32 %v3788_v8, %v3787_v6  ;;  %v3790_v13 = vpop.f32.mrb[6].mxu1  ;;  %v5269_v14 = vadd.f32 %v3716_v9, %v3715_v7  ;;  %v3718_v15 = vpop.f32.mrb[6].mxu0 }
 0x187   : > { %v3791_v18 = vpop.f32.mrb[7].mxu1  ;;  %v3719_v19 = vpop.f32.mrb[7].mxu0 }
 0x188   : > { %v5273_v20 = vadd.f32 %v3791_v18, %v3790_v13  ;;  %v5275_v21 = vadd.f32 %v3719_v19, %v3718_v15  ;;  %v4594_v18 = vld [vmem:[%s5129_s12 + $0x378] ss:$36 sps:$4 sm:$0xff]   ;;  %v4595_v19 = vld [vmem:[%s5129_s12 + $0x2a8] ss:$36 sps:$4 sm:$0xff]  }
 0x189   : > { %2432 = vmatmul.mubr.bf16.gmra.mrb[112].mxu1 %v4574_v10  ;;  %4182 = vmatmul.mubr.bf16.vlgmr.msra.gmra.mrb[112].mxu0 %v4575_v11 }
 0x18a   : > { %2439 = vmatprep.mubr.bf16.mxu1 %v4576_v16  ;;  %4185 = vmatprep.mubr.bf16.mxu0 %v4578_v17 }
 0x18c   : > { %v3793_v22 = vpop.f32.mrb[8].mxu1  ;;  %v3721_v23 = vpop.f32.mrb[8].mxu0 }
 0x18d   : > { %v3794_v24 = vpop.f32.mrb[9].mxu1  ;;  %v3722_v25 = vpop.f32.mrb[9].mxu0 }
 0x18e   : > { %v5279_v28 = vadd.f32 %v3794_v24, %v3793_v22  ;;  %v3796_v29 = vpop.f32.mrb[10].mxu1  ;;  %v5281_v30 = vadd.f32 %v3722_v25, %v3721_v23  ;;  %v3724_v31 = vpop.f32.mrb[10].mxu0  ;;  %v4596_v25 = vld [vmem:[%s5129_s12 + $0x3c4] ss:$36 sps:$4 sm:$0xff]  }
 0x18f   : > { %v3797_v34 = vpop.f32.mrb[11].mxu1  ;;  %v3725_v35 = vpop.f32.mrb[11].mxu0 }
 0x190   : > { %v5285_v36 = vadd.f32 %v3797_v34, %v3796_v29  ;;  %v5287_v37 = vadd.f32 %v3725_v35, %v3724_v31 }
 0x191   : > { %2440 = vmatmul.mubr.bf16.gmra.mrb[116].mxu1 %v4579_v26  ;;  %4186 = vmatmul.mubr.bf16.gmra.mrb[116].mxu0 %v4580_v27  ;;  %v4598_v26 = vld [vmem:[%s5129_s12 + $0x2f0] ss:$36 sps:$4 sm:$0xff]  }
 0x192   : > { %2447 = vmatprep.mubr.bf16.mxu1 %v4581_v32  ;;  %4189 = vmatprep.mubr.bf16.mxu0 %v4583_v33 }
 0x194   : > { %v3799_v38 = vpop.f32.mrb[12].mxu1  ;;  %v3727_v39 = vpop.f32.mrb[12].mxu0 }
 0x195   : > { %v3800_v40 = vpop.f32.mrb[13].mxu1  ;;  %v3728_v41 = vpop.f32.mrb[13].mxu0 }
 0x196   : > { %v5291_v44 = vadd.f32 %v3800_v40, %v3799_v38  ;;  %v3802_v45 = vpop.f32.mrb[14].mxu1  ;;  %v5293_v46 = vadd.f32 %v3728_v41, %v3727_v39  ;;  %v3730_v47 = vpop.f32.mrb[14].mxu0  ;;  %v4599_v40 = vld [vmem:[%s5129_s12 + $0x3c0] ss:$36 sps:$4 sm:$0xff]   ;;  %v4600_v41 = vld [vmem:[%s5129_s12 + $0x338] ss:$36 sps:$4 sm:$0xff]  }
 0x197   : > { %v3803_v50 = vpop.f32.mrb[15].mxu1  ;;  %v3731_v51 = vpop.f32.mrb[15].mxu0 }
 0x198   : > { %v5297_v52 = vadd.f32 %v3803_v50, %v3802_v45  ;;  %v5299_v53 = vadd.f32 %v3731_v51, %v3730_v47  ;;  %v4601_v47 = vld [vmem:[%s5129_s12 + $0x40c] ss:$36 sps:$4 sm:$0xff]  }
 0x199   : > { %2448 = vmatmul.mubr.bf16.gmra.mrb[120].mxu1 %v4584_v42  ;;  %4190 = vmatmul.mubr.bf16.gmra.mrb[120].mxu0 %v4585_v43 }
 0x19a   : > { %2455 = vmatprep.mubr.bf16.mxu1 %v4586_v48  ;;  %4193 = vmatprep.mubr.bf16.mxu0 %v4588_v49  ;;  %v4603_v48 = vld [vmem:[%s5129_s12 + $0x380] ss:$36 sps:$4 sm:$0xff]  }
 0x19c   : > { %v3821_v54 = vpop.f32.mrb[16].mxu1  ;;  %v3733_v55 = vpop.f32.mrb[16].mxu0 }
 0x19d   : > { %v3822_v56 = vpop.f32.mrb[17].mxu1  ;;  %v3734_v57 = vpop.f32.mrb[17].mxu0 }
 0x19e   : > { %v3823_v61 = vadd.f32 %v3822_v56, %v3821_v54  ;;  %v3824_v63 = vpop.f32.mrb[18].mxu1  ;;  %v5303_v0 = vadd.f32 %v3734_v57, %v3733_v55  ;;  %v3736_v1 = vpop.f32.mrb[18].mxu0 }
 0x19f   : > { %v3825_v6 = vpop.f32.mrb[19].mxu1  ;;  %v3737_v7 = vpop.f32.mrb[19].mxu0 }
 0x1a0   : > { %v5308_v8 = vadd.f32 %v3823_v61, %v5257_v62  ;;  %v3826_v9 = vadd.f32 %v3825_v6, %v3824_v63  ;;  %v5310_v10 = vadd.f32 %v3737_v7, %v3736_v1  ;;  %v4604_v61 = vld [vmem:[%s5129_s12 + $0x408] ss:$36 sps:$4 sm:$0xff]   ;;  %v4606_v6 = vld [vmem:[%s5129_s12 + $0x454] ss:$36 sps:$4 sm:$0xff]  }
 0x1a1   : > { %2456 = vmatmul.mubr.bf16.gmra.mrb[124].mxu1 %v4589_v58  ;;  %4194 = vmatmul.mubr.bf16.gmra.mrb[124].mxu0 %v4590_v59  ;;  %v4605_v63 = vld [vmem:[%s5129_s12 + $0x3c8] ss:$36 sps:$4 sm:$0xff]   ;;  %v4608_v7 = vld [vmem:[%s5129_s12 + $0x410] ss:$36 sps:$4 sm:$0xff]  }
 0x1a2   : > { %v5313_v11 = vadd.f32 %v3826_v9, %v5263_v5  ;;  %2463 = vmatprep.mubr.bf16.mxu1 %v4591_v2  ;;  %4197 = vmatprep.mubr.bf16.mxu0 %v4593_v3 }
 0x1a4   : > { %v3827_v13 = vpop.f32.mrb[20].mxu1  ;;  %v3739_v15 = vpop.f32.mrb[20].mxu0 }
 0x1a5   : > { %v3828_v16 = vpop.f32.mrb[21].mxu1  ;;  %v3740_v17 = vpop.f32.mrb[21].mxu0 }
 0x1a6   : > { %v3829_v62 = vadd.f32 %v3828_v16, %v3827_v13  ;;  %v3830_v22 = vpop.f32.mrb[22].mxu1  ;;  %v5317_v23 = vadd.f32 %v3740_v17, %v3739_v15  ;;  %v3742_v24 = vpop.f32.mrb[22].mxu0 }
 0x1a7   : > { %v3831_v27 = vpop.f32.mrb[23].mxu1  ;;  %v3743_v5 = vpop.f32.mrb[23].mxu0 }
 0x1a8   : > { %v5322_v29 = vadd.f32 %v3829_v62, %v5269_v14  ;;  %v3832_v31 = vadd.f32 %v3831_v27, %v3830_v22  ;;  %v5324_v32 = vadd.f32 %v3743_v5, %v3742_v24  ;;  %v4609_v24 = vld [vmem:[%s5129_s12 + $0x450] ss:$36 sps:$4 sm:$0xff]  }
 0x1a9   : > { %2464 = vmatmul.mubr.bf16.gmra.mrb[128].mxu1 %v4594_v18  ;;  %4198 = vmatmul.mubr.bf16.gmra.mrb[128].mxu0 %v4595_v19 }
 0x1aa   : > { %v5327_v33 = vadd.f32 %v3832_v31, %v5275_v21  ;;  %2471 = vmatprep.mubr.bf16.mxu1 %v4596_v25  ;;  %4201 = vmatprep.mubr.bf16.mxu0 %v4598_v26  ;;  %v4610_v25 = vld [vmem:[%s5129_s12 + $0x458] ss:$36 sps:$4 sm:$0xff]  }
 0x1ac   : > { %v3833_v34 = vpop.f32.mrb[24].mxu1  ;;  %v3745_v35 = vpop.f32.mrb[24].mxu0 }
 0x1ad   : > { %v3834_v38 = vpop.f32.mrb[25].mxu1  ;;  %v3746_v39 = vpop.f32.mrb[25].mxu0 }
 0x1ae   : > { %v3835_v14 = vadd.f32 %v3834_v38, %v3833_v34  ;;  %v3836_v42 = vpop.f32.mrb[26].mxu1  ;;  %v5331_v43 = vadd.f32 %v3746_v39, %v3745_v35  ;;  %v3748_v45 = vpop.f32.mrb[26].mxu0 }
 0x1af   : > { %v3837_v49 = vpop.f32.mrb[27].mxu1  ;;  %v3749_v21 = vpop.f32.mrb[27].mxu0 }
 0x1b0   : > { %v5336_v50 = vadd.f32 %v3835_v14, %v5281_v30  ;;  %v3838_v51 = vadd.f32 %v3837_v49, %v3836_v42  ;;  %v5338_v54 = vadd.f32 %v3749_v21, %v3748_v45 }
 0x1b1   : > { %2472 = vmatmul.mubr.bf16.gmra.mrb[132].mxu1 %v4599_v40  ;;  %4202 = vmatmul.mubr.bf16.gmra.mrb[132].mxu0 %v4600_v41 }
 0x1b2   : > { %v5341_v55 = vadd.f32 %v3838_v51, %v5287_v37  ;;  %2479 = vmatprep.mubr.bf16.mxu1 %v4601_v47  ;;  %4205 = vmatprep.mubr.bf16.mxu0 %v4603_v48 }
 0x1b4   : > { %v3839_v56 = vpop.f32.mrb[28].mxu1  ;;  %v3751_v57 = vpop.f32.mrb[28].mxu0 }
 0x1b5   : > { %v3840_v58 = vpop.f32.mrb[29].mxu1  ;;  %v3752_v59 = vpop.f32.mrb[29].mxu0 }
 0x1b6   : > { %v3841_v30 = vadd.f32 %v3840_v58, %v3839_v56  ;;  %v3842_v1 = vpop.f32.mrb[30].mxu1  ;;  %v5345_v2 = vadd.f32 %v3752_v59, %v3751_v57  ;;  %v3754_v3 = vpop.f32.mrb[30].mxu0 }
 0x1b7   : > { %v3843_v9 = vpop.f32.mrb[31].mxu1  ;;  %v3755_v37 = vpop.f32.mrb[31].mxu0 }
 0x1b8   : > { %v5350_v13 = vadd.f32 %v3841_v30, %v5293_v46  ;;  %v3844_v15 = vadd.f32 %v3843_v9, %v3842_v1  ;;  %v5352_v16 = vadd.f32 %v3755_v37, %v3754_v3 }
 0x1b9   : > { %2480 = vmatmul.mubr.bf16.gmra.mrb[136].mxu1 %v4604_v61  ;;  %4206 = vmatmul.mubr.bf16.gmra.mrb[136].mxu0 %v4605_v63 }
 0x1ba   : > { %v5355_v17 = vadd.f32 %v3844_v15, %v5299_v53  ;;  %2487 = vmatprep.mubr.bf16.mxu1 %v4606_v6  ;;  %4209 = vmatprep.mubr.bf16.mxu0 %v4608_v7 }
 0x1bc   : > { %v3845_v18 = vpop.f32.mrb[32].mxu1  ;;  %v3757_v19 = vpop.f32.mrb[32].mxu0 }
 0x1bd   : > { %v3846_v62 = vpop.f32.mrb[33].mxu1  ;;  %v3758_v22 = vpop.f32.mrb[33].mxu0 }
 0x1be   : > { %v3847_v26 = vadd.f32 %v3846_v62, %v3845_v18  ;;  %v3848_v27 = vpop.f32.mrb[34].mxu1  ;;  %v3759_v46 = vadd.f32 %v3758_v22, %v3757_v19  ;;  %v3760_v5 = vpop.f32.mrb[34].mxu0 }
 0x1bf   : > { %v3849_v31 = vpop.f32.mrb[35].mxu1  ;;  %v3761_v34 = vpop.f32.mrb[35].mxu0 }
 0x1c0   : > { %v5360_v35 = vadd.f32 %v3847_v26, %v5303_v0  ;;  %v3850_v38 = vadd.f32 %v3849_v31, %v3848_v27  ;;  %v3762_v53 = vadd.f32 %v3761_v34, %v3760_v5 }
 0x1c1   : > { %2488 = vmatmul.mubr.bf16.gmra.mrb[140].mxu1 %v4609_v24  ;;  %4210 = vmatmul.mubr.bf16.gmra.mrb[140].mxu0 %v4610_v25 }
 0x1c2   : > { %v5363_v39 = vadd.f32 %v3850_v38, %v5310_v10 }
 0x1c4   : > { %v3851_v40 = vpop.f32.mrb[36].mxu1  ;;  %v3763_v41 = vpop.f32.mrb[36].mxu0 }
 0x1c5   : > { %v3852_v14 = vpop.f32.mrb[37].mxu1  ;;  %v3764_v42 = vpop.f32.mrb[37].mxu0 }
 0x1c6   : > { %v3853_v45 = vadd.f32 %v3852_v14, %v3851_v40  ;;  %v3854_v47 = vpop.f32.mrb[38].mxu1  ;;  %v3765_v48 = vadd.f32 %v3764_v42, %v3763_v41  ;;  %v3766_v49 = vpop.f32.mrb[38].mxu0 }
 0x1c7   : > { %v3855_v21 = vpop.f32.mrb[39].mxu1  ;;  %v3767_v51 = vpop.f32.mrb[39].mxu0 }
 0x1c8   : > { %v5366_v0 = vadd.f32 %v3853_v45, %v5317_v23  ;;  %v3856_v56 = vadd.f32 %v3855_v21, %v3854_v47  ;;  %v3768_v57 = vadd.f32 %v3767_v51, %v3766_v49 }
 0x1ca   : > { %v5369_v58 = vadd.f32 %v3856_v56, %v5324_v32 }
 0x1cc   : > { %v3857_v10 = vpop.f32.mrb[40].mxu1  ;;  %v3769_v59 = vpop.f32.mrb[40].mxu0 }
 0x1cd   : > { %v3858_v61 = vpop.f32.mrb[41].mxu1  ;;  %v3770_v63 = vpop.f32.mrb[41].mxu0 }
 0x1ce   : > { %v3859_v30 = vadd.f32 %v3858_v61, %v3857_v10  ;;  %v3860_v1 = vpop.f32.mrb[42].mxu1  ;;  %v5371_v3 = vadd.f32 %v3770_v63, %v3769_v59  ;;  %v3772_v6 = vpop.f32.mrb[42].mxu0 }
 0x1cf   : > { %v3861_v7 = vpop.f32.mrb[43].mxu1  ;;  %v3773_v9 = vpop.f32.mrb[43].mxu0 }
 0x1d0   : > { %v5374_v37 = vadd.f32 %v3859_v30, %v5331_v43  ;;  %v3862_v23 = vadd.f32 %v3861_v7, %v3860_v1  ;;  %v3774_v15 = vadd.f32 %v3773_v9, %v3772_v6 }
 0x1d2   : > { %v5377_v18 = vadd.f32 %v3862_v23, %v5338_v54 }
 0x1d4   : > { %v3863_v32 = vpop.f32.mrb[44].mxu1  ;;  %v3775_v19 = vpop.f32.mrb[44].mxu0 }
 0x1d5   : > { %v3864_v62 = vpop.f32.mrb[45].mxu1  ;;  %v3776_v22 = vpop.f32.mrb[45].mxu0 }
 0x1d6   : > { %v3865_v24 = vadd.f32 %v3864_v62, %v3863_v32  ;;  %v3866_v25 = vpop.f32.mrb[46].mxu1  ;;  %v5379_v26 = vadd.f32 %v3776_v22, %v3775_v19  ;;  %v3778_v27 = vpop.f32.mrb[46].mxu0 }
 0x1d7   : > { %v3867_v5 = vpop.f32.mrb[47].mxu1  ;;  %v3779_v31 = vpop.f32.mrb[47].mxu0 }
 0x1d8   : > { %v5382_v34 = vadd.f32 %v3865_v24, %v5345_v2  ;;  %v3868_v43 = vadd.f32 %v3867_v5, %v3866_v25  ;;  %v5384_v38 = vadd.f32 %v3779_v31, %v3778_v27 }
 0x1da   : > { %v5387_v54 = vadd.f32 %v3868_v43, %v5352_v16 }
 0x1dc   : > { %v3869_v40 = vpop.f32.mrb[48].mxu1  ;;  %v3933_v41 = vpop.f32.mrb[48].mxu0 }
 0x1dd   : > { %v3870_v14 = vpop.f32.mrb[49].mxu1  ;;  %v3934_v42 = vpop.f32.mrb[49].mxu0 }
 0x1de   : > { %v3871_v45 = vadd.f32 %v3870_v14, %v3869_v40  ;;  %v3935_v47 = vadd.f32 %v3934_v42, %v3933_v41  ;;  %v3872_v49 = vpop.f32.mrb[50].mxu1  ;;  %v3936_v21 = vpop.f32.mrb[50].mxu0 }
 0x1df   : > { %v3873_v51 = vpop.f32.mrb[51].mxu1  ;;  %v3937_v56 = vpop.f32.mrb[51].mxu0 }
 0x1e0   : > { %v5389_v10 = vadd.f32 %v3871_v45, %v3759_v46  ;;  %v5392_v2 = vadd.f32 %v3935_v47, %v5308_v8  ;;  %v3874_v59 = vadd.f32 %v3873_v51, %v3872_v49  ;;  %v3938_v61 = vadd.f32 %v3937_v56, %v3936_v21 }
 0x1e2   : > { %v5394_v63 = vadd.f32 %v3874_v59, %v3762_v53  ;;  %v5397_v16 = vadd.f32 %v3938_v61, %v5313_v11 }
 0x1e4   : > { %v3875_v30 = vpop.f32.mrb[52].mxu1  ;;  %v3939_v1 = vpop.f32.mrb[52].mxu0 }
 0x1e5   : > { %v3876_v6 = vpop.f32.mrb[53].mxu1  ;;  %v3940_v7 = vpop.f32.mrb[53].mxu0 }
 0x1e6   : > { %v3877_v9 = vadd.f32 %v3876_v6, %v3875_v30  ;;  %v3941_v23 = vadd.f32 %v3940_v7, %v3939_v1  ;;  %v3878_v32 = vpop.f32.mrb[54].mxu1  ;;  %v3942_v19 = vpop.f32.mrb[54].mxu0 }
 0x1e7   : > { %v3879_v46 = vpop.f32.mrb[55].mxu1  ;;  %v3943_v62 = vpop.f32.mrb[55].mxu0 }
 0x1e8   : > { %v5399_v22 = vadd.f32 %v3877_v9, %v3765_v48  ;;  %v5402_v8 = vadd.f32 %v3941_v23, %v5322_v29  ;;  %v3880_v53 = vadd.f32 %v3879_v46, %v3878_v32  ;;  %v3944_v24 = vadd.f32 %v3943_v62, %v3942_v19 }
 0x1ea   : > { %v5404_v25 = vadd.f32 %v3880_v53, %v3768_v57  ;;  %v5407_v11 = vadd.f32 %v3944_v24, %v5327_v33 }
 0x1ec   : > { %v3881_v27 = vpop.f32.mrb[56].mxu1  ;;  %v3945_v5 = vpop.f32.mrb[56].mxu0 }
 0x1ed   : > { %v3882_v31 = vpop.f32.mrb[57].mxu1  ;;  %v3946_v43 = vpop.f32.mrb[57].mxu0 }
 0x1ee   : > { %v3883_v40 = vadd.f32 %v3882_v31, %v3881_v27  ;;  %v3947_v41 = vadd.f32 %v3946_v43, %v3945_v5  ;;  %v3884_v14 = vpop.f32.mrb[58].mxu1  ;;  %v3948_v42 = vpop.f32.mrb[58].mxu0 }
 0x1ef   : > { %v3885_v48 = vpop.f32.mrb[59].mxu1  ;;  %v3949_v45 = vpop.f32.mrb[59].mxu0 }
 0x1f0   : > { %v5410_v29 = vadd.f32 %v3883_v40, %v5371_v3  ;;  %v5413_v47 = vadd.f32 %v3947_v41, %v5336_v50  ;;  %v3886_v57 = vadd.f32 %v3885_v48, %v3884_v14  ;;  %v3950_v49 = vadd.f32 %v3949_v45, %v3948_v42 }
 0x1f2   : > { %v5415_v33 = vadd.f32 %v3886_v57, %v3774_v15  ;;  %v5418_v21 = vadd.f32 %v3950_v49, %v5341_v55 }
 0x1f4   : > { %v3887_v51 = vpop.f32.mrb[60].mxu1  ;;  %v3951_v56 = vpop.f32.mrb[60].mxu0 }
 0x1f5   : > { %v3888_v59 = vpop.f32.mrb[61].mxu1  ;;  %v3952_v61 = vpop.f32.mrb[61].mxu0 }
 0x1f6   : > { %v3889_v30 = vadd.f32 %v3888_v59, %v3887_v51  ;;  %v3953_v1 = vadd.f32 %v3952_v61, %v3951_v56  ;;  %v3890_v6 = vpop.f32.mrb[62].mxu1  ;;  %v3954_v7 = vpop.f32.mrb[62].mxu0 }
 0x1f7   : > { %v3891_v3 = vpop.f32.mrb[63].mxu1  ;;  %v3955_v9 = vpop.f32.mrb[63].mxu0 }
 0x1f8   : > { %v5421_v50 = vadd.f32 %v3889_v30, %v5379_v26  ;;  %v5424_v23 = vadd.f32 %v3953_v1, %v5350_v13  ;;  %v3892_v15 = vadd.f32 %v3891_v3, %v3890_v6  ;;  %v3956_v32 = vadd.f32 %v3955_v9, %v3954_v7 }
 0x1fa   : > { %v5427_v55 = vadd.f32 %v3892_v15, %v5384_v38  ;;  %v5430_v19 = vadd.f32 %v3956_v32, %v5355_v17 }
 0x1fc   : > { %v3893_v46 = vpop.f32.mrb[64].mxu1  ;;  %v3957_v62 = vpop.f32.mrb[64].mxu0 }
 0x1fd   : > { %v3894_v53 = vpop.f32.mrb[65].mxu1  ;;  %v3958_v24 = vpop.f32.mrb[65].mxu0 }
 0x1fe   : > { %v3895_v27 = vadd.f32 %v3894_v53, %v3893_v46  ;;  %v3959_v5 = vadd.f32 %v3958_v24, %v3957_v62  ;;  %v3896_v31 = vpop.f32.mrb[66].mxu1  ;;  %v3960_v26 = vpop.f32.mrb[66].mxu0 }
 0x1ff   : > { %v3897_v43 = vpop.f32.mrb[67].mxu1  ;;  %v3961_v40 = vpop.f32.mrb[67].mxu0 }
 0x200   : > { %v5433_v13 = vadd.f32 %v3895_v27, %v5255_v60  ;;  %v5436_v41 = vadd.f32 %v3959_v5, %v5360_v35  ;;  %v3898_v38 = vadd.f32 %v3897_v43, %v3896_v31  ;;  %v3962_v14 = vadd.f32 %v3961_v40, %v3960_v26 }
 0x202   : > { %v5439_v17 = vadd.f32 %v3898_v38, %v5261_v4  ;;  %v5442_v42 = vadd.f32 %v3962_v14, %v5363_v39 }
 0x204   : > { %v3899_v48 = vpop.f32.mrb[68].mxu1  ;;  %v3963_v45 = vpop.f32.mrb[68].mxu0 }
 0x205   : > { %v3900_v57 = vpop.f32.mrb[69].mxu1  ;;  %v3964_v49 = vpop.f32.mrb[69].mxu0 }
 0x206   : > { %v3901_v51 = vadd.f32 %v3900_v57, %v3899_v48  ;;  %v3965_v56 = vadd.f32 %v3964_v49, %v3963_v45  ;;  %v3902_v59 = vpop.f32.mrb[70].mxu1  ;;  %v3966_v60 = vpop.f32.mrb[70].mxu0 }
 0x207   : > { %v3903_v61 = vpop.f32.mrb[71].mxu1  ;;  %v3967_v30 = vpop.f32.mrb[71].mxu0 }
 0x208   : > { %v5445_v35 = vadd.f32 %v3901_v51, %v5267_v12  ;;  %v5448_v1 = vadd.f32 %v3965_v56, %v5366_v0  ;;  %v3904_v4 = vadd.f32 %v3903_v61, %v3902_v59  ;;  %v3968_v6 = vadd.f32 %v3967_v30, %v3966_v60 }
 0x20a   : > { %v5451_v39 = vadd.f32 %v3904_v4, %v5273_v20  ;;  %v5454_v7 = vadd.f32 %v3968_v6, %v5369_v58 }
 0x20c   : > { %v3905_v3 = vpop.f32.mrb[72].mxu1  ;;  %v3969_v9 = vpop.f32.mrb[72].mxu0 }
 0x20d   : > { %v3906_v15 = vpop.f32.mrb[73].mxu1  ;;  %v3970_v32 = vpop.f32.mrb[73].mxu0 }
 0x20e   : > { %v3907_v46 = vadd.f32 %v3906_v15, %v3905_v3  ;;  %v3971_v62 = vadd.f32 %v3970_v32, %v3969_v9  ;;  %v3908_v53 = vpop.f32.mrb[74].mxu1  ;;  %v3972_v12 = vpop.f32.mrb[74].mxu0 }
 0x20f   : > { %v3909_v24 = vpop.f32.mrb[75].mxu1  ;;  %v3973_v27 = vpop.f32.mrb[75].mxu0 }
 0x210   : > { %v5457_v0 = vadd.f32 %v3907_v46, %v5279_v28  ;;  %v5460_v5 = vadd.f32 %v3971_v62, %v5374_v37  ;;  %v3910_v20 = vadd.f32 %v3909_v24, %v3908_v53  ;;  %v3974_v31 = vadd.f32 %v3973_v27, %v3972_v12 }
 0x212   : > { %v5463_v58 = vadd.f32 %v3910_v20, %v5285_v36  ;;  %v5466_v26 = vadd.f32 %v3974_v31, %v5377_v18 }
 0x214   : > { %v3911_v43 = vpop.f32.mrb[76].mxu1  ;;  %v3975_v40 = vpop.f32.mrb[76].mxu0 }
 0x215   : > { %v3912_v38 = vpop.f32.mrb[77].mxu1  ;;  %v3976_v14 = vpop.f32.mrb[77].mxu0 }
 0x216   : > { %v3913_v48 = vadd.f32 %v3912_v38, %v3911_v43  ;;  %v3977_v45 = vadd.f32 %v3976_v14, %v3975_v40  ;;  %v3914_v57 = vpop.f32.mrb[78].mxu1  ;;  %v3978_v28 = vpop.f32.mrb[78].mxu0 }
 0x217   : > { %v3915_v49 = vpop.f32.mrb[79].mxu1  ;;  %v3979_v51 = vpop.f32.mrb[79].mxu0 }
 0x218   : > { %v5469_v37 = vadd.f32 %v3913_v48, %v5291_v44  ;;  %v5472_v56 = vadd.f32 %v3977_v45, %v5382_v34  ;;  %v3916_v36 = vadd.f32 %v3915_v49, %v3914_v57  ;;  %v3980_v59 = vadd.f32 %v3979_v51, %v3978_v28 }
 0x21a   : > { %v5475_v18 = vadd.f32 %v3916_v36, %v5297_v52  ;;  %v5478_v60 = vadd.f32 %v3980_v59, %v5387_v54 }
 0x21c   : > { %v3981_v61 = vpop.f32.mrb[80].mxu0  ;;  %v4045_v30 = vpop.f32.mrb[80].mxu1 }
 0x21d   : > { %v3982_v4 = vpop.f32.mrb[81].mxu0  ;;  %v4046_v6 = vpop.f32.mrb[81].mxu1 }
 0x21e   : > { %v3983_v3 = vadd.f32 %v3982_v4, %v3981_v61  ;;  %v4047_v9 = vadd.f32 %v4046_v6, %v4045_v30  ;;  %v3984_v15 = vpop.f32.mrb[82].mxu0  ;;  %v4048_v44 = vpop.f32.mrb[82].mxu1 }
 0x21f   : > { %v3985_v32 = vpop.f32.mrb[83].mxu0  ;;  %v4049_v46 = vpop.f32.mrb[83].mxu1 }
 0x220   : > { %v5481_v34 = vadd.f32 %v3983_v3, %v5389_v10  ;;  %v3986_v62 = vadd.f32 %v3985_v32, %v3984_v15  ;;  %v4050_v53 = vadd.f32 %v4049_v46, %v4048_v44  ;;  %v5484_v52 = vadd.f32 %v4047_v9, %v5392_v2 }
 0x222   : > { %v5487_v54 = vadd.f32 %v3986_v62, %v5394_v63  ;;  %v5490_v12 = vadd.f32 %v4050_v53, %v5397_v16 }
 0x224   : > { %v3987_v24 = vpop.f32.mrb[84].mxu0  ;;  %v4051_v27 = vpop.f32.mrb[84].mxu1 }
 0x225   : > { %v3988_v20 = vpop.f32.mrb[85].mxu0  ;;  %v4052_v31 = vpop.f32.mrb[85].mxu1 }
 0x226   : > { %v3989_v43 = vadd.f32 %v3988_v20, %v3987_v24  ;;  %v4053_v40 = vadd.f32 %v4052_v31, %v4051_v27  ;;  %v3990_v38 = vpop.f32.mrb[86].mxu0  ;;  %v4054_v10 = vpop.f32.mrb[86].mxu1 }
 0x227   : > { %v3991_v14 = vpop.f32.mrb[87].mxu0  ;;  %v4055_v48 = vpop.f32.mrb[87].mxu1 }
 0x228   : > { %v5493_v45 = vadd.f32 %v3989_v43, %v5399_v22  ;;  %v3992_v2 = vadd.f32 %v3991_v14, %v3990_v38  ;;  %v4056_v57 = vadd.f32 %v4055_v48, %v4054_v10  ;;  %v5496_v63 = vadd.f32 %v4053_v40, %v5402_v8 }
 0x22a   : > { %v5499_v16 = vadd.f32 %v3992_v2, %v5404_v25  ;;  %v5502_v28 = vadd.f32 %v4056_v57, %v5407_v11 }
 0x22c   : > { %v3993_v49 = vpop.f32.mrb[88].mxu0  ;;  %v4057_v51 = vpop.f32.mrb[88].mxu1 }
 0x22d   : > { %v3994_v36 = vpop.f32.mrb[89].mxu0  ;;  %v4058_v59 = vpop.f32.mrb[89].mxu1 }
 0x22e   : > { %v3995_v61 = vadd.f32 %v3994_v36, %v3993_v49  ;;  %v4059_v30 = vadd.f32 %v4058_v59, %v4057_v51  ;;  %v3996_v4 = vpop.f32.mrb[90].mxu0  ;;  %v4060_v22 = vpop.f32.mrb[90].mxu1 }
 0x22f   : > { %v3997_v6 = vpop.f32.mrb[91].mxu0  ;;  %v4061_v3 = vpop.f32.mrb[91].mxu1 }
 0x230   : > { %v5505_v9 = vadd.f32 %v3995_v61, %v5410_v29  ;;  %v3998_v8 = vadd.f32 %v3997_v6, %v3996_v4  ;;  %v4062_v15 = vadd.f32 %v4061_v3, %v4060_v22  ;;  %v5508_v25 = vadd.f32 %v4059_v30, %v5413_v47 }
 0x232   : > { %v5511_v11 = vadd.f32 %v3998_v8, %v5415_v33  ;;  %v5514_v44 = vadd.f32 %v4062_v15, %v5418_v21 }
 0x234   : > { %v3999_v32 = vpop.f32.mrb[92].mxu0  ;;  %v4063_v46 = vpop.f32.mrb[92].mxu1 }
 0x235   : > { %v4000_v62 = vpop.f32.mrb[93].mxu0  ;;  %v4064_v53 = vpop.f32.mrb[93].mxu1 }
 0x236   : > { %v4001_v24 = vadd.f32 %v4000_v62, %v3999_v32  ;;  %v4065_v27 = vadd.f32 %v4064_v53, %v4063_v46  ;;  %v4002_v20 = vpop.f32.mrb[94].mxu0  ;;  %v4066_v29 = vpop.f32.mrb[94].mxu1 }
 0x237   : > { %v4003_v31 = vpop.f32.mrb[95].mxu0  ;;  %v4067_v43 = vpop.f32.mrb[95].mxu1 }
 0x238   : > { %v5517_v40 = vadd.f32 %v4001_v24, %v5421_v50  ;;  %v4004_v47 = vadd.f32 %v4003_v31, %v4002_v20  ;;  %v4068_v38 = vadd.f32 %v4067_v43, %v4066_v29  ;;  %v5520_v33 = vadd.f32 %v4065_v27, %v5424_v23 }
 0x23a   : > { %v5523_v21 = vadd.f32 %v4004_v47, %v5427_v55  ;;  %v5526_v10 = vadd.f32 %v4068_v38, %v5430_v19 }
 0x23c   : > { %v4005_v14 = vpop.f32.mrb[96].mxu0  ;;  %v4069_v48 = vpop.f32.mrb[96].mxu1 }
 0x23d   : > { %v4006_v2 = vpop.f32.mrb[97].mxu0  ;;  %v4070_v57 = vpop.f32.mrb[97].mxu1 }
 0x23e   : > { %v4007_v49 = vadd.f32 %v4006_v2, %v4005_v14  ;;  %v4071_v51 = vadd.f32 %v4070_v57, %v4069_v48  ;;  %v4008_v36 = vpop.f32.mrb[98].mxu0  ;;  %v4072_v50 = vpop.f32.mrb[98].mxu1 }
 0x23f   : > { %v4009_v59 = vpop.f32.mrb[99].mxu0  ;;  %v4073_v61 = vpop.f32.mrb[99].mxu1 }
 0x240   : > { %v5529_v30 = vadd.f32 %v4007_v49, %v5433_v13  ;;  %v4010_v23 = vadd.f32 %v4009_v59, %v4008_v36  ;;  %v4074_v4 = vadd.f32 %v4073_v61, %v4072_v50  ;;  %v5532_v55 = vadd.f32 %v4071_v51, %v5436_v41 }
 0x242   : > { %v5535_v19 = vadd.f32 %v4010_v23, %v5439_v17  ;;  %v5538_v22 = vadd.f32 %v4074_v4, %v5442_v42 }
 0x244   : > { %v4011_v6 = vpop.f32.mrb[100].mxu0  ;;  %v4075_v3 = vpop.f32.mrb[100].mxu1 }
 0x245   : > { %v4012_v8 = vpop.f32.mrb[101].mxu0  ;;  %v4076_v15 = vpop.f32.mrb[101].mxu1 }
 0x246   : > { %v4013_v32 = vadd.f32 %v4012_v8, %v4011_v6  ;;  %v4077_v46 = vadd.f32 %v4076_v15, %v4075_v3  ;;  %v4014_v62 = vpop.f32.mrb[102].mxu0  ;;  %v4078_v13 = vpop.f32.mrb[102].mxu1 }
 0x247   : > { %v4015_v53 = vpop.f32.mrb[103].mxu0  ;;  %v4079_v24 = vpop.f32.mrb[103].mxu1 }
 0x248   : > { %v5541_v27 = vadd.f32 %v4013_v32, %v5445_v35  ;;  %v4016_v41 = vadd.f32 %v4015_v53, %v4014_v62  ;;  %v4080_v20 = vadd.f32 %v4079_v24, %v4078_v13  ;;  %v5544_v17 = vadd.f32 %v4077_v46, %v5448_v1 }
 0x24a   : > { %v5547_v42 = vadd.f32 %v4016_v41, %v5451_v39  ;;  %v5550_v29 = vadd.f32 %v4080_v20, %v5454_v7  ;;  %v5576_v41 = vld [vmem:[#allocation8] ss:$0 sm:$0xff] }
 0x24c   : > { %v4017_v31 = vpop.f32.mrb[104].mxu0  ;;  %v4081_v43 = vpop.f32.mrb[104].mxu1 }
 0x24d   : > { %v4018_v47 = vpop.f32.mrb[105].mxu0  ;;  %v4082_v38 = vpop.f32.mrb[105].mxu1 }
 0x24e   : > { %v4019_v14 = vadd.f32 %v4018_v47, %v4017_v31  ;;  %v4083_v48 = vadd.f32 %v4082_v38, %v4081_v43  ;;  %v4020_v2 = vpop.f32.mrb[106].mxu0  ;;  %v4084_v35 = vpop.f32.mrb[106].mxu1  ;;  %v5579_v43 = vld [vmem:[#allocation9] ss:$0 sm:$0xff] }
 0x24f   : > { %v4021_v57 = vpop.f32.mrb[107].mxu0  ;;  %v4085_v49 = vpop.f32.mrb[107].mxu1 }
 0x250   : > { %v5553_v51 = vadd.f32 %v4019_v14, %v5457_v0  ;;  %v4022_v1 = vadd.f32 %v4021_v57, %v4020_v2  ;;  %v4086_v36 = vadd.f32 %v4085_v49, %v4084_v35  ;;  %v5556_v39 = vadd.f32 %v4083_v48, %v5460_v5 }
 0x252   : > { %v5559_v7 = vadd.f32 %v4022_v1, %v5463_v58  ;;  %v5562_v50 = vadd.f32 %v4086_v36, %v5466_v26 }
 0x254   : > { %v4023_v59 = vpop.f32.mrb[108].mxu0  ;;  %v4087_v61 = vpop.f32.mrb[108].mxu1 }
 0x255   : > { %v4024_v23 = vpop.f32.mrb[109].mxu0  ;;  %v4088_v4 = vpop.f32.mrb[109].mxu1 }
 0x256   : > { %v4025_v6 = vadd.f32 %v4024_v23, %v4023_v59  ;;  %v4089_v3 = vadd.f32 %v4088_v4, %v4087_v61  ;;  %v4026_v8 = vpop.f32.mrb[110].mxu0  ;;  %v4090_v0 = vpop.f32.mrb[110].mxu1 }
 0x257   : > { %v4027_v15 = vpop.f32.mrb[111].mxu0  ;;  %v4091_v32 = vpop.f32.mrb[111].mxu1 }
 0x258   : > { %v5565_v46 = vadd.f32 %v4025_v6, %v5469_v37  ;;  %v4028_v5 = vadd.f32 %v4027_v15, %v4026_v8  ;;  %v4092_v62 = vadd.f32 %v4091_v32, %v4090_v0  ;;  %v5568_v58 = vadd.f32 %v4089_v3, %v5472_v56 }
 0x25a   : > { %v5571_v26 = vadd.f32 %v4028_v5, %v5475_v18  ;;  %v5574_v13 = vadd.f32 %v4092_v62, %v5478_v60 }
 0x25c   : > { %v4093_v53 = vpop.f32.mrb[112].mxu1  ;;  %v4183_v24 = vpop.f32.mrb[112].mxu0 }
 0x25d   : > { %v2539_v20 = vadd.f32 %v4183_v24, %v5496_v63  ;;  %v4094_v31 = vpop.f32.mrb[113].mxu1  ;;  %v2530_v37 = vpop.f32.mrb[113].mxu0 }
 0x25e   : > { %v4095_v47 = vadd.f32 %v4094_v31, %v4093_v53  ;;  %v2531_v56 = vadd.f32 %v2530_v37, %v5484_v52  ;;  %v4096_v38 = vpop.f32.mrb[114].mxu1  ;;  %v4184_v14 = vpop.f32.mrb[114].mxu0 }
 0x25f   : > { %v2765_v18 = vmul.f32 %v5576_v41, %v2539_v20  ;;  %v2542_v60 = vadd.f32 %v4184_v14, %v5502_v28  ;;  %v4097_v48 = vpop.f32.mrb[115].mxu1  ;;  %v2533_v2 = vpop.f32.mrb[115].mxu0 }
 0x260   : > { %v2763_v35 = vmul.f32 %v5576_v41, %v2531_v56  ;;  %v4098_v57 = vadd.f32 %v4097_v48, %v4096_v38  ;;  %v2534_v63 = vadd.f32 %v2533_v2, %v5490_v12  ;;  %v5587_v49 = vadd.f32 %v4095_v47, %v5481_v34 }
 0x261   : > { %v5590_v1 = vadd.f32 %v5579_v43, %v2765_v18  ;;  %v2766_v52 = vmul.f32 %v5576_v41, %v2542_v60 }
 0x262   : > { %v5594_v36 = vadd.f32 %v5579_v43, %v2763_v35  ;;  %v2764_v28 = vmul.f32 %v5576_v41, %v2534_v63  ;;  %v5598_v59 = vadd.f32 %v4098_v57, %v5487_v54 }
 0x263   : > { %v2836_v61 = vmul.f32 0.5, %v5590_v1  ;;  %v5602_v12 = vadd.f32 %v5579_v43, %v2766_v52 }
 0x264   : > { %v2834_v34 = vmul.f32 0.5, %v5594_v36  ;;  %v5606_v23 = vadd.f32 %v5579_v43, %v2764_v28  ;;  %v4099_v4 = vpop.f32.mrb[116].mxu1  ;;  %v4187_v6 = vpop.f32.mrb[116].mxu0 }
 0x265   : > { %4611 = vtanh.f32 %v2836_v61  ;;  %v2837_v3 = vmul.f32 0.5, %v5602_v12  ;;  %v2555_v8 = vadd.f32 %v4187_v6, %v5520_v33  ;;  %v4100_v0 = vpop.f32.mrb[117].mxu1  ;;  %v2546_v54 = vpop.f32.mrb[117].mxu0 }
 0x266   : > { %4613 = vtanh.f32 %v2834_v34  ;;  %v2835_v15 = vmul.f32 0.5, %v5606_v23  ;;  %v4101_v32 = vadd.f32 %v4100_v0, %v4099_v4  ;;  %v2547_v5 = vadd.f32 %v2546_v54, %v5508_v25  ;;  %v4102_v62 = vpop.f32.mrb[118].mxu1  ;;  %v4188_v53 = vpop.f32.mrb[118].mxu0 }
 0x267   : > { %4615 = vtanh.f32 %v2837_v3  ;;  %v2769_v24 = vmul.f32 %v5576_v41, %v2555_v8  ;;  %v2558_v20 = vadd.f32 %v4188_v53, %v5526_v10  ;;  %v4103_v31 = vpop.f32.mrb[119].mxu1  ;;  %v2549_v37 = vpop.f32.mrb[119].mxu0 }
 0x268   : > { %4617 = vtanh.f32 %v2835_v15  ;;  %v2767_v33 = vmul.f32 %v5576_v41, %v2547_v5  ;;  %v4104_v47 = vadd.f32 %v4103_v31, %v4102_v62  ;;  %v2550_v56 = vadd.f32 %v2549_v37, %v5514_v44 }
 0x269   : > { %v5617_v38 = vadd.f32 %v5579_v43, %v2769_v24  ;;  %v2770_v25 = vmul.f32 %v5576_v41, %v2558_v20  ;;  %v5621_v14 = vadd.f32 %v4101_v32, %v5493_v45 }
 0x26a   : > { %v5624_v18 = vadd.f32 %v5579_v43, %v2767_v33  ;;  %v2768_v10 = vmul.f32 %v5576_v41, %v2550_v56  ;;  %v5628_v60 = vadd.f32 %v4104_v47, %v5499_v16 }
 0x26b   : > { %v2840_v48 = vmul.f32 0.5, %v5617_v38  ;;  %v5632_v44 = vadd.f32 %v5579_v43, %v2770_v25 }
 0x26c   : > { %v2838_v2 = vmul.f32 0.5, %v5624_v18  ;;  %v5636_v35 = vadd.f32 %v5579_v43, %v2768_v10  ;;  %v4105_v45 = vpop.f32.mrb[120].mxu1  ;;  %v4191_v57 = vpop.f32.mrb[120].mxu0 }
 0x26d   : > { %4619 = vtanh.f32 %v2840_v48  ;;  %v2841_v63 = vmul.f32 0.5, %v5632_v44  ;;  %v2571_v52 = vadd.f32 %v4191_v57, %v5544_v17  ;;  %v4106_v28 = vpop.f32.mrb[121].mxu1  ;;  %v2562_v16 = vpop.f32.mrb[121].mxu0 }
 0x26e   : > { %4621 = vtanh.f32 %v2838_v2  ;;  %v2839_v61 = vmul.f32 0.5, %v5636_v35  ;;  %v4107_v34 = vadd.f32 %v4106_v28, %v4105_v45  ;;  %v2563_v4 = vadd.f32 %v2562_v16, %v5532_v55  ;;  %v4108_v6 = vpop.f32.mrb[122].mxu1  ;;  %v4192_v3 = vpop.f32.mrb[122].mxu0 }
 0x26f   : > { %v4612_v8 = vpop.eup %4611  ;;  %4623 = vtanh.f32 %v2841_v63  ;;  %v2773_v0 = vmul.f32 %v5576_v41, %v2571_v52  ;;  %v2574_v54 = vadd.f32 %v4192_v3, %v5550_v29  ;;  %v4109_v15 = vpop.f32.mrb[123].mxu1 }
 0x270   : > { %v2565_v32 = vpop.f32.mrb[123].mxu0  ;;  %v4614_v5 = vpop.eup %4613  ;;  %v2900_v17 = vadd.f32 1.0, %v4612_v8  ;;  %4625 = vtanh.f32 %v2839_v61  ;;  %v2771_v62 = vmul.f32 %v5576_v41, %v2563_v4  ;;  %v5645_v53 = vadd.f32 %v4109_v15, %v4108_v6 }
 0x271   : > { %v4616_v24 = vpop.eup %4615  ;;  %v2898_v55 = vadd.f32 1.0, %v4614_v5  ;;  %v5648_v20 = vadd.f32 %v5579_v43, %v2773_v0  ;;  %v2774_v31 = vmul.f32 %v5576_v41, %v2574_v54  ;;  %v2566_v37 = vadd.f32 %v2565_v32, %v5538_v22 }
 0x272   : > { %v4618_v29 = vpop.eup %4617  ;;  %v2932_v33 = vmul.f32 0.5, %v2900_v17  ;;  %v2901_v47 = vadd.f32 1.0, %v4616_v24  ;;  %v5653_v56 = vadd.f32 %v5579_v43, %v2771_v62  ;;  %v5656_v25 = vadd.f32 %v4107_v34, %v5505_v9 }
 0x273   : > { %v2930_v10 = vmul.f32 0.5, %v2898_v55  ;;  %v2899_v48 = vadd.f32 1.0, %v4618_v29  ;;  %v2844_v2 = vmul.f32 0.5, %v5648_v20  ;;  %v5660_v45 = vadd.f32 %v5579_v43, %v2774_v31 }
 0x274   : > { %v2964_v57 = vmul.f32 %v2932_v33, %v5590_v1  ;;  %v2933_v22 = vmul.f32 0.5, %v2901_v47  ;;  %v2842_v63 = vmul.f32 0.5, %v5653_v56  ;;  %v2772_v52 = vmul.f32 %v5576_v41, %v2566_v37  ;;  %v4111_v28 = vpop.f32.mrb[124].mxu1  ;;  %v4195_v16 = vpop.f32.mrb[124].mxu0 }
 0x275   : > { %v2962_v9 = vmul.f32 %v2930_v10, %v5594_v36  ;;  %v2931_v61 = vmul.f32 0.5, %v2899_v48  ;;  %4627 = vtanh.f32 %v2844_v2  ;;  %v2845_v34 = vmul.f32 0.5, %v5660_v45  ;;  %v4112_v4 = vpop.f32.mrb[125].mxu1  ;;  %v2578_v6 = vpop.f32.mrb[125].mxu0 }
 0x276   : > { %v2965_v3 = vmul.f32 %v2933_v22, %v5602_v12  ;;  %4629 = vtanh.f32 %v2842_v63  ;;  %v5670_v1 = vadd.f32 %v5579_v43, %v2772_v52  ;;  %v2587_v8 = vadd.f32 %v4195_v16, %v5568_v58  ;;  %v4114_v0 = vpop.f32.mrb[126].mxu1  ;;  %v4196_v54 = vpop.f32.mrb[126].mxu0 }
 0x277   : > { %v4620_v15 = vpop.eup %4619  ;;  %v2963_v32 = vmul.f32 %v2931_v61, %v5606_v23  ;;  %4631 = vtanh.f32 %v2845_v34  ;;  %v5674_v36 = vadd.f32 %v4112_v4, %v4111_v28  ;;  %v2579_v5 = vadd.f32 %v2578_v6, %v5556_v39  ;;  %v4115_v17 = vpop.f32.mrb[127].mxu1 }
 0x278   : > { %v2581_v62 = vpop.f32.mrb[127].mxu0  ;;  %v4622_v12 = vpop.eup %4621  ;;  %v3606_v24 = vpack.c.bf16 %v2965_v3, %v2964_v57  ;;  %v2904_v55 = vadd.f32 1.0, %v4620_v15  ;;  %v2843_v31 = vmul.f32 0.5, %v5670_v1  ;;  %v2777_v58 = vmul.f32 %v5576_v41, %v2587_v8 }
 0x279   : > { %v4624_v37 = vpop.eup %4623  ;;  %v3601_v29 = vpack.c.bf16 %v2963_v32, %v2962_v9  ;;  %v2902_v33 = vadd.f32 1.0, %v4622_v12  ;;  %v2775_v23 = vmul.f32 %v5576_v41, %v2579_v5  ;;  %v2590_v47 = vadd.f32 %v4196_v54, %v5574_v13 }
 0x27a   : > { %v4626_v10 = vpop.eup %4625  ;;  %3678 = vst [vmem:[%s5683_s25 + $0x8] sm:$0xff] %v3606_v24   ;;  %v2936_v39 = vmul.f32 0.5, %v2904_v55  ;;  %v2905_v48 = vadd.f32 1.0, %v4624_v37  ;;  %4633 = vtanh.f32 %v2843_v31  ;;  %v5687_v2 = vadd.f32 %v5579_v43, %v2777_v58 }
 0x27b   : > { %3602 = vst [vmem:[%s5683_s25] sm:$0xff] %v3601_v29   ;;  %v2934_v57 = vmul.f32 0.5, %v2902_v33  ;;  %v2903_v22 = vadd.f32 1.0, %v4626_v10  ;;  %v5691_v63 = vadd.f32 %v5579_v43, %v2775_v23  ;;  %v2778_v13 = vmul.f32 %v5576_v41, %v2590_v47 }
 0x27c   : > { %v2968_v52 = vmul.f32 %v2936_v39, %v5617_v38  ;;  %v2937_v28 = vmul.f32 0.5, %v2905_v48  ;;  %v2848_v16 = vmul.f32 0.5, %v5687_v2  ;;  %v5696_v9 = vadd.f32 %v4115_v17, %v4114_v0  ;;  %v4117_v61 = vpop.f32.mrb[128].mxu1  ;;  %v4199_v34 = vpop.f32.mrb[128].mxu0 }
 0x27d   : > { %v2966_v4 = vmul.f32 %v2934_v57, %v5624_v18  ;;  %v2935_v6 = vmul.f32 0.5, %v2903_v22  ;;  %v2846_v3 = vmul.f32 0.5, %v5691_v63  ;;  %v5701_v8 = vadd.f32 %v5579_v43, %v2778_v13  ;;  %v4118_v54 = vpop.f32.mrb[129].mxu1  ;;  %v2594_v15 = vpop.f32.mrb[129].mxu0 }
 0x27e   : > { %v2969_v32 = vmul.f32 %v2937_v28, %v5632_v44  ;;  %4635 = vtanh.f32 %v2848_v16  ;;  %v2582_v38 = vadd.f32 %v2581_v62, %v5562_v50  ;;  %v2603_v0 = vadd.f32 %v4199_v34, %v5621_v14  ;;  %v4120_v5 = vpop.f32.mrb[130].mxu1  ;;  %v4200_v17 = vpop.f32.mrb[130].mxu0 }
 0x27f   : > { %v4628_v12 = vpop.eup %4627  ;;  %v2967_v18 = vmul.f32 %v2935_v6, %v5636_v35  ;;  %4637 = vtanh.f32 %v2846_v3  ;;  %v2849_v24 = vmul.f32 0.5, %v5701_v8  ;;  %v5708_v55 = vadd.f32 %v4118_v54, %v4117_v61  ;;  %v4121_v31 = vpop.f32.mrb[131].mxu1 }
 0x280   : > { %v2597_v58 = vpop.f32.mrb[131].mxu0  ;;  %v4630_v44 = vpop.eup %4629  ;;  %v3616_v37 = vpack.c.bf16 %v2969_v32, %v2968_v52  ;;  %v2908_v29 = vadd.f32 1.0, %v4628_v12  ;;  %v2776_v50 = vmul.f32 %v5576_v41, %v2582_v38  ;;  %v2781_v14 = vmul.f32 %v5576_v41, %v2603_v0 }
 0x281   : > { %v4632_v62 = vpop.eup %4631  ;;  %v3611_v33 = vpack.c.bf16 %v2967_v18, %v2966_v4  ;;  %v2906_v23 = vadd.f32 1.0, %v4630_v44  ;;  %4639 = vtanh.f32 %v2849_v24  ;;  %v2595_v35 = vadd.f32 %v2594_v15, %v5587_v49 }
 0x282   : > { %3680 = vst [vmem:[%s5683_s25 + $0x18] sm:$0xff] %v3616_v37   ;;  %v2940_v47 = vmul.f32 0.5, %v2908_v29  ;;  %v2909_v10 = vadd.f32 1.0, %v4632_v62  ;;  %v5715_v39 = vadd.f32 %v5579_v43, %v2776_v50  ;;  %v5718_v48 = vadd.f32 %v5579_v43, %v2781_v14 }
 0x283   : > { %3679 = vst [vmem:[%s5683_s25 + $0x10] sm:$0xff] %v3611_v33   ;;  %v2938_v57 = vmul.f32 0.5, %v2906_v23  ;;  %v2779_v22 = vmul.f32 %v5576_v41, %v2595_v35  ;;  %v2606_v13 = vadd.f32 %v4200_v17, %v5628_v60  ;;  %v5723_v52 = vadd.f32 %v4121_v31, %v4120_v5 }
 0x284   : > { %v4634_v28 = vpop.eup %4633  ;;  %v2972_v49 = vmul.f32 %v2940_v47, %v5648_v20  ;;  %v2941_v16 = vmul.f32 0.5, %v2909_v10  ;;  %v2847_v61 = vmul.f32 0.5, %v5715_v39  ;;  %v2852_v34 = vmul.f32 0.5, %v5718_v48  ;;  %v4123_v4 = vpop.f32.mrb[132].mxu1 }
 0x285   : > { %v4203_v6 = vpop.f32.mrb[132].mxu0  ;;  %v2970_v3 = vmul.f32 %v2938_v57, %v5653_v56  ;;  %v2907_v54 = vadd.f32 1.0, %v4634_v28  ;;  %v5730_v15 = vadd.f32 %v5579_v43, %v2779_v22  ;;  %v2782_v60 = vmul.f32 %v5576_v41, %v2606_v13  ;;  %v4124_v32 = vpop.f32.mrb[133].mxu1 }
 0x286   : > { %v2610_v38 = vpop.f32.mrb[133].mxu0  ;;  %v2973_v0 = vmul.f32 %v2941_v16, %v5660_v45  ;;  %4641 = vtanh.f32 %v2847_v61  ;;  %v2598_v20 = vadd.f32 %v2597_v58, %v5598_v59  ;;  %v2458_v5 = vadd.f32 %v5674_v36, %v5517_v40  ;;  %v4126_v17 = vpop.f32.mrb[134].mxu1 }
 0x287   : > { %v4204_v12 = vpop.f32.mrb[134].mxu0  ;;  %v2939_v18 = vmul.f32 0.5, %v2907_v54  ;;  %4643 = vtanh.f32 %v2852_v34  ;;  %v2850_v56 = vmul.f32 0.5, %v5730_v15  ;;  %v5739_v24 = vadd.f32 %v5579_v43, %v2782_v60  ;;  %v4127_v31 = vpop.f32.mrb[135].mxu1 }
 0x288   : > { %v2613_v44 = vpop.f32.mrb[135].mxu0  ;;  %v4636_v37 = vpop.eup %4635  ;;  %v3626_v45 = vpack.c.bf16 %v2973_v0, %v2972_v49  ;;  %v2780_v29 = vmul.f32 %v5576_v41, %v2598_v20  ;;  %v2619_v59 = vadd.f32 %v4203_v6, %v2458_v5  ;;  %v4125_v58 = vadd.f32 %v4124_v32, %v4123_v4 }
 0x289   : > { %v4638_v50 = vpop.eup %4637  ;;  %v2971_v40 = vmul.f32 %v2939_v18, %v5670_v1  ;;  %v2912_v36 = vadd.f32 1.0, %v4636_v37  ;;  %4645 = vtanh.f32 %v2850_v56  ;;  %v2853_v14 = vmul.f32 0.5, %v5739_v24 }
 0x28a   : > { %3682 = vst [vmem:[%s5683_s25 + $0x28] sm:$0xff] %v3626_v45   ;;  %v2910_v62 = vadd.f32 1.0, %v4638_v50  ;;  %v5746_v33 = vadd.f32 %v5579_v43, %v2780_v29  ;;  %v2785_v23 = vmul.f32 %v5576_v41, %v2619_v59  ;;  %v2611_v35 = vadd.f32 %v2610_v38, %v5656_v25 }
 0x28b   : > { %v4640_v47 = vpop.eup %4639  ;;  %v3621_v10 = vpack.c.bf16 %v2971_v40, %v2970_v3  ;;  %v2944_v57 = vmul.f32 0.5, %v2912_v36  ;;  %4647 = vtanh.f32 %v2853_v14  ;;  %v2461_v1 = vadd.f32 %v5696_v9, %v5523_v21 }
 0x28c   : > { %v2942_v22 = vmul.f32 0.5, %v2910_v62  ;;  %v2913_v13 = vadd.f32 1.0, %v4640_v47  ;;  %v2851_v28 = vmul.f32 0.5, %v5746_v33  ;;  %v5754_v49 = vadd.f32 %v5579_v43, %v2785_v23  ;;  %v4129_v16 = vpop.f32.mrb[136].mxu1  ;;  %v4207_v61 = vpop.f32.mrb[136].mxu0 }
 0x28d   : > { %3681 = vst [vmem:[%s5683_s25 + $0x20] sm:$0xff] %v3621_v10   ;;  %v2976_v34 = vmul.f32 %v2944_v57, %v5687_v2  ;;  %v2783_v25 = vmul.f32 %v5576_v41, %v2611_v35  ;;  %v2622_v4 = vadd.f32 %v4204_v12, %v2461_v1  ;;  %v4128_v6 = vadd.f32 %v4127_v31, %v4126_v17  ;;  %v4130_v3 = vpop.f32.mrb[137].mxu1  ;;  %v2626_v54 = vpop.f32.mrb[137].mxu0 }
 0x28e   : > { %v2974_v21 = vmul.f32 %v2942_v22, %v5691_v63  ;;  %v2945_v9 = vmul.f32 0.5, %v2913_v13  ;;  %4649 = vtanh.f32 %v2851_v28  ;;  %v2856_v60 = vmul.f32 0.5, %v5754_v49  ;;  %v4132_v32 = vpop.f32.mrb[138].mxu1  ;;  %v4208_v38 = vpop.f32.mrb[138].mxu0 }
 0x28f   : > { %v5762_v0 = vadd.f32 %v5579_v43, %v2783_v25  ;;  %v2786_v20 = vmul.f32 %v5576_v41, %v2622_v4  ;;  %v2453_v2 = vadd.f32 %v5645_v53, %v5511_v11  ;;  %v2474_v5 = vadd.f32 %v4125_v58, %v5541_v27  ;;  %v4133_v17 = vpop.f32.mrb[139].mxu1  ;;  %v5768_v12 = vpop.f32.mrb[139].mxu0 }
 0x290   : > { %v4642_v63 = vpop.eup %4641  ;;  %v2977_v18 = vmul.f32 %v2945_v9, %v5701_v8  ;;  %4651 = vtanh.f32 %v2856_v60  ;;  %v5771_v56 = vadd.f32 %v4130_v3, %v4129_v16  ;;  %v2466_v31 = vadd.f32 %v5708_v55, %v5529_v30 }
 0x291   : > { %v4644_v37 = vpop.eup %4643  ;;  %v2911_v45 = vadd.f32 1.0, %v4642_v63  ;;  %v2854_v29 = vmul.f32 0.5, %v5762_v0  ;;  %v5777_v11 = vadd.f32 %v5579_v43, %v2786_v20  ;;  %v2614_v27 = vadd.f32 %v2613_v44, %v2453_v2 }
 0x292   : > { %v3636_v53 = vpack.c.bf16 %v2977_v18, %v2976_v34  ;;  %v2916_v59 = vadd.f32 1.0, %v4644_v37  ;;  %v2635_v58 = vadd.f32 %v4207_v61, %v2474_v5  ;;  %v2627_v50 = vadd.f32 %v2626_v54, %v2466_v31 }
 0x293   : > { %v4646_v8 = vpop.eup %4645  ;;  %v2943_v40 = vmul.f32 0.5, %v2911_v45  ;;  %4653 = vtanh.f32 %v2854_v29  ;;  %v2857_v36 = vmul.f32 0.5, %v5777_v11  ;;  %v2784_v14 = vmul.f32 %v5576_v41, %v2614_v27 }
 0x294   : > { %3684 = vst [vmem:[%s5683_s25 + $0x38] sm:$0xff] %v3636_v53   ;;  %v2948_v30 = vmul.f32 0.5, %v2916_v59  ;;  %v2914_v55 = vadd.f32 1.0, %v4646_v8  ;;  %v2789_v62 = vmul.f32 %v5576_v41, %v2635_v58  ;;  %v2787_v23 = vmul.f32 %v5576_v41, %v2627_v50  ;;  %v4135_v35 = vpop.f32.mrb[140].mxu1  ;;  %v4211_v44 = vpop.f32.mrb[140].mxu0 }
 0x295   : > { %v4648_v47 = vpop.eup %4647  ;;  %v2975_v10 = vmul.f32 %v2943_v40, %v5715_v39  ;;  %4655 = vtanh.f32 %v2857_v36  ;;  %v5786_v57 = vadd.f32 %v5579_v43, %v2784_v14  ;;  %v2477_v1 = vadd.f32 %v4128_v6, %v5547_v42  ;;  %v4136_v22 = vpop.f32.mrb[141].mxu1 }
 0x296   : > { %v2642_v13 = vpop.f32.mrb[141].mxu0  ;;  %v2946_v28 = vmul.f32 0.5, %v2914_v55  ;;  %v2917_v16 = vadd.f32 1.0, %v4648_v47  ;;  %v5790_v61 = vadd.f32 %v5579_v43, %v2789_v62  ;;  %v4138_v34 = vpop.f32.mrb[142].mxu1  ;;  %v5794_v39 = vadd.f32 %v5579_v43, %v2787_v23 }
 0x297   : > { %v4212_v25 = vpop.f32.mrb[142].mxu0  ;;  %v3631_v4 = vpack.c.bf16 %v2975_v10, %v2974_v21  ;;  %v2855_v3 = vmul.f32 0.5, %v5786_v57  ;;  %v2638_v54 = vadd.f32 %v4208_v38, %v2477_v1  ;;  %v4139_v9 = vpop.f32.mrb[143].mxu1  ;;  %v2980_v6 = vmul.f32 %v2948_v30, %v5718_v48 }
 0x298   : > { %v2645_v60 = vpop.f32.mrb[143].mxu0  ;;  %v4650_v42 = vpop.eup %4649  ;;  %v2949_v20 = vmul.f32 0.5, %v2917_v16  ;;  %v2860_v2 = vmul.f32 0.5, %v5790_v61  ;;  %v4134_v5 = vadd.f32 %v4133_v17, %v4132_v32  ;;  %v2858_v21 = vmul.f32 0.5, %v5794_v39 }
 0x299   : > { %3683 = vst [vmem:[%s5683_s25 + $0x30] sm:$0xff] %v3631_v4   ;;  %v2915_v63 = vadd.f32 1.0, %v4650_v42  ;;  %4657 = vtanh.f32 %v2855_v3  ;;  %v2790_v18 = vmul.f32 %v5576_v41, %v2638_v54  ;;  %v2469_v38 = vadd.f32 %v5723_v52, %v5535_v19 }
 0x29a   : > { %v4652_v31 = vpop.eup %4651  ;;  %v2981_v37 = vmul.f32 %v2949_v20, %v5739_v24  ;;  %4659 = vtanh.f32 %v2860_v2  ;;  %v4137_v48 = vadd.f32 %v4136_v22, %v4135_v35  ;;  %v2978_v45 = vmul.f32 %v2946_v28, %v5730_v15 }
 0x29b   : > { %v2947_v29 = vmul.f32 0.5, %v2915_v63  ;;  %v2920_v32 = vadd.f32 1.0, %v4652_v31  ;;  %v5806_v17 = vadd.f32 %v5579_v43, %v2790_v18  ;;  %v2630_v53 = vadd.f32 %v5768_v12, %v2469_v38 }
 0x29c   : > { %v3646_v27 = vpack.c.bf16 %v2981_v37, %v2980_v6  ;;  %v2490_v59 = vadd.f32 %v4137_v48, %v5565_v46  ;;  %v2482_v24 = vadd.f32 %v5771_v56, %v5553_v51  ;;  %4661 = vtanh.f32 %v2858_v21 }
 0x29d   : > { %v4654_v58 = vpop.eup %4653  ;;  %v2979_v50 = vmul.f32 %v2947_v29, %v5746_v33  ;;  %v2861_v19 = vmul.f32 0.5, %v5806_v17  ;;  %v4140_v52 = vadd.f32 %v4139_v9, %v4138_v34  ;;  %v2952_v15 = vmul.f32 0.5, %v2920_v32 }
 0x29e   : > { %3686 = vst [vmem:[%s5683_s25 + $0x48] sm:$0xff] %v3646_v27   ;;  %v2788_v8 = vmul.f32 %v5576_v41, %v2630_v53  ;;  %v2651_v40 = vadd.f32 %v4211_v44, %v2490_v59  ;;  %v2643_v36 = vadd.f32 %v2642_v13, %v2482_v24  ;;  %v2918_v46 = vadd.f32 1.0, %v4654_v58 }
 0x29f   : > { %v4656_v12 = vpop.eup %4655  ;;  %v3641_v14 = vpack.c.bf16 %v2979_v50, %v2978_v45  ;;  %4663 = vtanh.f32 %v2861_v19  ;;  %v2493_v51 = vadd.f32 %v4140_v52, %v5571_v26  ;;  %v2485_v23 = vadd.f32 %v4134_v5, %v5559_v7 }
 0x2a0   : > { %v2921_v56 = vadd.f32 1.0, %v4656_v12  ;;  %v2827_v33 = vadd.f32 %v5579_v43, %v2788_v8  ;;  %v2793_v30 = vmul.f32 %v5576_v41, %v2651_v40  ;;  %v2791_v55 = vmul.f32 %v5576_v41, %v2643_v36 }
 0x2a1   : > { %3685 = vst [vmem:[%s5683_s25 + $0x40] sm:$0xff] %v3641_v14   ;;  %v2654_v62 = vadd.f32 %v4212_v25, %v2493_v51  ;;  %v2984_v35 = vmul.f32 %v2952_v15, %v5754_v49  ;;  %v2950_v22 = vmul.f32 0.5, %v2918_v46  ;;  %v2646_v28 = vadd.f32 %v2645_v60, %v2485_v23 }
 0x2a2   : > { %v2953_v44 = vmul.f32 0.5, %v2921_v56  ;;  %v2859_v47 = vmul.f32 0.5, %v2827_v33  ;;  %v2832_v10 = vadd.f32 %v5579_v43, %v2793_v30  ;;  %v2830_v26 = vadd.f32 %v5579_v43, %v2791_v55 }
 0x2a3   : > { %v4658_v1 = vpop.eup %4657  ;;  %v2794_v13 = vmul.f32 %v5576_v41, %v2654_v62  ;;  %v2792_v3 = vmul.f32 %v5576_v41, %v2646_v28 }
 0x2a4   : > { %v4660_v16 = vpop.eup %4659  ;;  %v2985_v34 = vmul.f32 %v2953_v44, %v5777_v11  ;;  %v2919_v25 = vadd.f32 1.0, %v4658_v1  ;;  %4665 = vtanh.f32 %v2859_v47  ;;  %v2864_v7 = vmul.f32 0.5, %v2832_v10 }
 0x2a5   : > { %v2862_v4 = vmul.f32 0.5, %v2830_v26  ;;  %v2833_v49 = vadd.f32 %v5579_v43, %v2794_v13  ;;  %v2924_v42 = vadd.f32 1.0, %v4660_v16  ;;  %v2831_v20 = vadd.f32 %v5579_v43, %v2792_v3 }
 0x2a6   : > { %v3656_v54 = vpack.c.bf16 %v2985_v34, %v2984_v35  ;;  %v2951_v9 = vmul.f32 0.5, %v2919_v25  ;;  %4667 = vtanh.f32 %v2864_v7  ;;  %v4662_v6 = vpop.eup %4661  ;;  %v2982_v11 = vmul.f32 %v2950_v22, %v5762_v0 }
 0x2a7   : > { %4669 = vtanh.f32 %v2862_v4  ;;  %v2865_v60 = vmul.f32 0.5, %v2833_v49  ;;  %v2863_v63 = vmul.f32 0.5, %v2831_v20  ;;  %v2956_v41 = vmul.f32 0.5, %v2924_v42 }
 0x2a8   : > { %3688 = vst [vmem:[%s5683_s25 + $0x58] sm:$0xff] %v3656_v54   ;;  %v2983_v2 = vmul.f32 %v2951_v9, %v5786_v57  ;;  %v2922_v31 = vadd.f32 1.0, %v4662_v6 }
 0x2a9   : > { %v4664_v5 = vpop.eup %4663  ;;  %4671 = vtanh.f32 %v2865_v60  ;;  %v2988_v48 = vmul.f32 %v2956_v41, %v5790_v61 }
 0x2aa   : > { %v3651_v21 = vpack.c.bf16 %v2983_v2, %v2982_v11  ;;  %v2925_v18 = vadd.f32 1.0, %v4664_v5  ;;  %4673 = vtanh.f32 %v2863_v63  ;;  %v2954_v0 = vmul.f32 0.5, %v2922_v31 }
 0x2ac   : > { %3687 = vst [vmem:[%s5683_s25 + $0x50] sm:$0xff] %v3651_v21   ;;  %v2957_v37 = vmul.f32 0.5, %v2925_v18  ;;  %v2986_v58 = vmul.f32 %v2954_v0, %v5794_v39 }
 0x2ae   : > { %v4666_v38 = vpop.eup %4665  ;;  %v2989_v43 = vmul.f32 %v2957_v37, %v5806_v17 }
 0x2af   : > { %v2923_v45 = vadd.f32 1.0, %v4666_v38 }
 0x2b0   : > { %v4668_v29 = vpop.eup %4667  ;;  %v3666_v57 = vpack.c.bf16 %v2989_v43, %v2988_v48 }
 0x2b1   : > { %v4670_v32 = vpop.eup %4669  ;;  %v2955_v27 = vmul.f32 0.5, %v2923_v45  ;;  %v2928_v53 = vadd.f32 1.0, %v4668_v29 }
 0x2b2   : > { %3690 = vst [vmem:[%s5683_s25 + $0x68] sm:$0xff] %v3666_v57   ;;  %v2926_v59 = vadd.f32 1.0, %v4670_v32 }
 0x2b3   : > { %v4672_v24 = vpop.eup %4671  ;;  %v2987_v50 = vmul.f32 %v2955_v27, %v2827_v33  ;;  %v2960_v19 = vmul.f32 0.5, %v2928_v53 }
 0x2b4   : > { %v2929_v61 = vadd.f32 1.0, %v4672_v24  ;;  %v4674_v52 = vpop.eup %4673  ;;  %v2958_v15 = vmul.f32 0.5, %v2926_v59 }
 0x2b5   : > { %v3661_v17 = vpack.c.bf16 %v2987_v50, %v2986_v58  ;;  %v2927_v40 = vadd.f32 1.0, %v4674_v52  ;;  %v2992_v36 = vmul.f32 %v2960_v19, %v2832_v10 }
 0x2b6   : > { %v2961_v8 = vmul.f32 0.5, %v2929_v61  ;;  %v2990_v46 = vmul.f32 %v2958_v15, %v2830_v26 }
 0x2b7   : > { %3689 = vst [vmem:[%s5683_s25 + $0x60] sm:$0xff] %v3661_v17   ;;  %v2959_v14 = vmul.f32 0.5, %v2927_v40 }
 0x2b8   : > { %v2993_v12 = vmul.f32 %v2961_v8, %v2833_v49 }
 0x2b9   : > { %v2991_v51 = vmul.f32 %v2959_v14, %v2831_v20 }
 0x2ba   : > { %v3676_v39 = vpack.c.bf16 %v2993_v12, %v2992_v36 }
 0x2bb   : > { %v3671_v56 = vpack.c.bf16 %v2991_v51, %v2990_v46 }
 0x2bc   : > { %3692 = vst [vmem:[%s5683_s25 + $0x78] sm:$0xff] %v3676_v39  }
 0x2bd   : > { %3691 = vst [vmem:[%s5683_s25 + $0x70] sm:$0xff] %v3671_v56  }
 0x2be   : > { %4802 = shalt.err (!%p4799_p0)
}
 0x2bf   : > { %s4803_s29 = scalar_lea.hbm %s5844_s6, 2048  ;;  %s4807_s10 = scalar_lea.hbm %s5901_s4, 4096 }
 0x2c0   : > { %p4804_p4 = scmp.ne.s32.totalorder %s5844_s6, %s4803_s29  ;;  %p4808_p12 = scmp.lt.u32.totalorder %s5844_s6, %s5901_s4 }
 0x2c1   : > { %p4809_p1 = scmp.lt.u32.totalorder %s4807_s10, %s4803_s29  ;;  %p4811_p13 = scmp.lt.u32.totalorder %s4803_s29, %s5844_s6 }
 0x2c2   : > { %p4805_p2 = pnand %p4804_p4, %p5069_p10 }
 0x2c3   : > { %p4810_p11 = por %p4809_p1, %p4808_p12 }
 0x2c4   : > { %p4806_p8 = pneg %p4805_p2 }
 0x2c5   : > { %p4812_p6 = por %p4811_p13, %p4810_p11 }
 0x2c7   : > { %p4813_p3 = pnand %p4812_p6, %p4806_p8 }
 0x2c9   : > { %4816 = shalt.err (!%p4813_p3)
}
 0x2ca   : > { %s4890_s25 = smov 64   ;;  %s4891_s27 = smov 4  }
 0x2cb   : > { %4246 = dma.vmem_to_hbm [thread:$0]  (%p5069_p10), %s5846_s11, 2048, %s5844_s6, %s3155_s7, %s4890_s25, %s4890_s25, %s4891_s27  }
 0x2cc PF: > { %s5921_s21 = sld [smem:[#allocation16_spill]]  ;;  %s3184_s28 = sand.u32 1, %s4859_s15  }
 0x2cd   : > { %p5923_p7 = scmp.ge.s32.totalorder %s4879_s20, 2  ;;  %s3185_s8 = scalar_lea.sflag [#allocation5], %s3184_s28 }
 0x2d2   : > { %p5922_p5 = scmp.ne.s32.totalorder %s5921_s21, 0 }
 0x2d4   : > { %p4263_p9 = pnand %p5923_p7, %p5922_p5 }
 0x2d6   : > { %4854 = dma.done.wait (!%p4263_p9), %s3185_s8, 2048  }
 0x2d7   : > { %4856 = vsyncadd (!%p4263_p9), %s3185_s8, 4294965248  ;;  %s22_s20 = sadd.s32 1, %s4879_s20   ;;  %s5924_s15 = smov %s4863_s16 }
 0x2d8   : > { %p19_p0 = scmp.ge.s32.totalorder %s22_s20, 4   ;;  %s5925_s16 = smov %s4867_s17 }
 0x2d9   : > { %s5926_s17 = smov %s5085_s24  ;;  %s5927_s18 = smov %s4875_s19 }
 0x2da   : > { %s5928_s19 = smov %s5930_s26  ;;  %21 = sbr.rel (!%p19_p0) target bundleno = 8 (0x8), region = 104 }
 0x2e1   :  { %3190 = vsyncpa [#allocation4], 1 }
 0x2e2   :  { %3192 = vsyncpa [#allocation4 + $0x1], 1 }
 0x2e3   :  { %3193 = vsyncpa [#allocation7], 1 }
 0x2e4   :  { %3194 = vsyncpa [#allocation10], 1 }
 0x2e5   :  { %3195 = vsyncpa [#allocation5], 1 }
 0x2e6   :  { %3197 = vsyncpa [#allocation5 + $0x1], 1 }

</bundles_post_ra>
